<compile_context>
chip_gen: v7x
topology: tpu7x:2x2x1
jax: 0.10.0
libtpu: 0.0.40
codegen_flags: <defaults>
</compile_context>

<pallas_src>
import functools

import jax
import jax.numpy as jnp
import numpy as np
from jax import lax
from jax.experimental import pallas as pl
from jax.experimental.pallas import tpu as pltpu


# -----------------------------------------------------------------------------
# Fused Pallas kernel (one grid step == one batch element)
# -----------------------------------------------------------------------------
def _awsca_fused_kernel(
    h, w,                # static spatial size (Python ints)
    x_ref,               # (1, C, HW)    f32   channel-major activation
    pansa_ref,           # (1, 3, HW)    f32   conv3x3(pan[:, k]) per pan channel
    lr_ref,              # (1, 32, HW2)  f32   channel-major lr
    dpatch_ref,          # (1, HW2, 36C) f32   stride-4 6x6 patches of x
    w_pan_ref,           # (C, 3)        f32
    w_eff_ref,           # (1, 36C)      f32   collapsed conv_down∘spe_conv weight
    w_a_t_ref,           # (32, C//r)    f32   (w_fc1 @ w_lr)^T folded
    w_fc2_ref,           # (C, C//r)     f32
    w_final_ref,         # (C, 9C)       bf16  final 3x3 conv (co, (ky*3+kx)*C+ci)
    b_final_ref,         # (C, 1)        f32
    masks_ref,           # (9, 1, HW)    f32   precomputed border masks per tap
    scal_ref,            # (2,)          f32   [SMEM]  [b_eff, prelu_alpha]
    out_ref,             # (1, C, HW)    f32   lane-dense output
):
    f32 = jnp.float32
    c = x_ref.shape[1]
    hw = h * w

    x = x_ref[0]                                             # (C, HW) f32

    # ---- spatial gate: sa = pan . (w_pan^T @ GAP(x)); 3x3 conv hoisted by
    # linearity into pan_sa, so the gate is 3 scalar dots + 3 broadcast FMAs.
    k_s = jnp.sum(x, axis=1, keepdims=True) * (1.0 / hw)     # (C, 1) == GAP(x)
    w_pan = w_pan_ref[...]                                   # (C, 3)
    pansa = pansa_ref[0]                                     # (3, HW)
    gate_pre = jnp.zeros((1, hw), f32)
    for j in range(3):
        v_j = jnp.sum(w_pan[:, j:j + 1] * k_s)               # scalar
        gate_pre = gate_pre + v_j * pansa[j:j + 1, :]
    gate = jax.nn.sigmoid(gate_pre)                          # (1, HW)

    # ---- channel attention:
    #   ca = sigmoid(W2 . PReLU(W1 . W_lr . (lr @ k_c)))
    # with k_c collapsed to (dpatch . w_eff + b_eff) and the big K=36C
    # contraction reordered onto the MXU:  u = (lr @ dpatch) . w_eff + b_eff*Σlr
    b_eff = scal_ref[0]
    alpha = scal_ref[1]
    lr_cm = lr_ref[0]                                        # (32, HW2)
    mmat = jnp.dot(lr_cm, dpatch_ref[0],
                   preferred_element_type=f32)               # (32, 36C) on MXU
    u = (jnp.sum(mmat * w_eff_ref[...], axis=1, keepdims=True)
         + b_eff * jnp.sum(lr_cm, axis=1, keepdims=True))    # (32, 1)
    w_a_t = w_a_t_ref[...]                                   # (32, C//r)
    w_fc2 = w_fc2_ref[...]                                   # (C,  C//r)
    cr = w_fc2.shape[1]
    y2 = jnp.zeros((c, 1), f32)
    for j in range(cr):
        y_j = jnp.sum(w_a_t[:, j:j + 1] * u)                 # scalar (fc1∘w_lr)
        y_j = jnp.where(y_j >= 0, y_j, alpha * y_j)          # PReLU
        y2 = y2 + y_j * w_fc2[:, j:j + 1]
    ca = jax.nn.sigmoid(y2)                                  # (C, 1)

    # ---- gated activation + final 3x3 conv as ONE (C,9C)@(9C,HW) bf16 matmul.
    # Taps = lane rolls of xg with precomputed border masks (XLU slot; no
    # padded scratch, no per-tap relayout copies).
    xg = gate * x                                            # (C, HW) f32
    taps = []
    for t in range(9):
        ky, kx = t // 3, t % 3
        s = (ky - 1) * w + (kx - 1)                          # tap[p] = xg[p + s]
        rolled = xg if s == 0 else pltpu.roll(xg, shift=(-s) % hw, axis=1)
        taps.append(rolled * masks_ref[t])                   # (C, HW) masked
    slab = jnp.concatenate(taps, axis=0).astype(jnp.bfloat16)    # (9C, HW) bf16
    acc = jnp.dot(w_final_ref[...], slab,
                  preferred_element_type=f32)                # (C, HW) f32, MXU
    # bias + channel gate + lane-dense store (no transpose)
    out_ref[0] = (acc + b_final_ref[...]) * ca


# -----------------------------------------------------------------------------
# Wrapper: layout plumbing + x-independent preprocessing in XLA, all per-batch
# compute in the single fused Pallas kernel.
# -----------------------------------------------------------------------------
def awsca_forward(x_nchw, lr_nchw, pan_nchw, params):
    f32 = jnp.float32
    hp = lax.Precision.HIGHEST
    b, c, h, w = x_nchw.shape
    hw = h * w
    h2 = (h + 2 * 2 - 6) // 4 + 1
    w2 = (w + 2 * 2 - 6) // 4 + 1
    hw2 = h2 * w2
    assert lr_nchw.shape[2] == h2 and lr_nchw.shape[3] == w2
    cr = params["w_fc1"].shape[0]

    x_nchw = x_nchw.astype(f32)

    # channel-major views: pure reshapes of the NCHW inputs (no transposes)
    x_cm = x_nchw.reshape(b, c, hw)
    lr_cm = lr_nchw.astype(f32).reshape(b, 32, hw2)

    # sa 3x3 conv hoisted out of the kernel by linearity (independent of x):
    # pan_sa[b, k, :] = conv3x3(pan[b, k], w_sa), flattened.
    w_sa = params["w_sa"].astype(f32)                                 # (1,1,3,3)
    pan_r = pan_nchw.astype(f32).reshape(b * 3, 1, h, w)
    pan_sa = lax.conv_general_dilated(
        pan_r, w_sa, (1, 1), [(1, 1), (1, 1)],
        dimension_numbers=("NCHW", "OIHW", "NCHW"),
        precision=hp).reshape(b, 3, hw)

    # conv_down ∘ spe_conv collapse (single output channel)
    w_spe_vec = params["w_spe"][0, :, 0, 0].astype(f32)               # (c,)
    w_eff = jnp.einsum("oikl,o->kli", params["w_down"].astype(f32),
                       w_spe_vec, precision=hp).reshape(1, 36 * c)    # (1, 36c)
    b_eff = jnp.dot(params["b_down"].astype(f32), w_spe_vec, precision=hp)

    # stride-4 6x6 patches of x for the collapsed downsample conv (~2.25x of x).
    # TODO(synk): at production resolutions gather these with in-kernel strided
    # loads from the resident x block instead of duplicating HBM traffic.
    xpad2 = jnp.pad(x_nchw, ((0, 0), (0, 0), (2, 2), (2, 2)))
    cols = []
    for kh in range(6):
        for kw in range(6):
            cols.append(xpad2[:, :, kh:kh + 4 * (h2 - 1) + 1:4,
                              kw:kw + 4 * (w2 - 1) + 1:4])
    dpatch = jnp.stack(cols, axis=-1)                  # (b, c, h2, w2, 36)
    dpatch = dpatch.transpose(0, 2, 3, 4, 1).reshape(b, hw2, 36 * c)

    # weight preprocessing (layout + tiny folds, done once by XLA)
    w_pan = params["w_pan"][:, :, 0, 0].astype(f32)                   # (c, 3)
    w_lr = params["w_lr"][:, :, 0, 0].astype(f32)                     # (c, 32)
    w_a_t = jnp.dot(params["w_fc1"].astype(f32), w_lr, precision=hp).T  # (32, c//r)
    w_fc2 = params["w_fc2"].astype(f32)                               # (c, c//r)
    w_final = params["w_final"].astype(f32).transpose(0, 2, 3, 1)     # (c,3,3,c)
    w_final = w_final.reshape(c, 9 * c).astype(jnp.bfloat16)          # bf16 MXU op
    b_final = params["b_final"].reshape(c, 1).astype(f32)
    scal = jnp.stack([b_eff, params["prelu_alpha"].reshape(())]).astype(f32)

    # precomputed border masks for the 9 rolled taps of the final 3x3 conv
    yy, xx = np.meshgrid(np.arange(h), np.arange(w), indexing="ij")
    masks_np = np.zeros((9, 1, hw), np.float32)
    for t in range(9):
        dy, dx = t // 3 - 1, t % 3 - 1
        valid = ((yy + dy >= 0) & (yy + dy < h) &
                 (xx + dx >= 0) & (xx + dx < w))
        masks_np[t, 0] = valid.reshape(-1).astype(np.float32)
    masks = jnp.asarray(masks_np)

    kernel = functools.partial(_awsca_fused_kernel, h, w)
    smem = pltpu.MemorySpace.SMEM

    out = pl.pallas_call(
        kernel,
        out_shape=jax.ShapeDtypeStruct((b, c, hw), f32),
        grid=(b,),
        in_specs=[
            pl.BlockSpec((1, c, hw), lambda i: (i, 0, 0)),
            pl.BlockSpec((1, 3, hw), lambda i: (i, 0, 0)),
            pl.BlockSpec((1, 32, hw2), lambda i: (i, 0, 0)),
            pl.BlockSpec((1, hw2, 36 * c), lambda i: (i, 0, 0)),
            pl.BlockSpec((c, 3), lambda i: (0, 0)),
            pl.BlockSpec((1, 36 * c), lambda i: (0, 0)),
            pl.BlockSpec((32, cr), lambda i: (0, 0)),
            pl.BlockSpec((c, cr), lambda i: (0, 0)),
            pl.BlockSpec((c, 9 * c), lambda i: (0, 0)),
            pl.BlockSpec((c, 1), lambda i: (0, 0)),
            pl.BlockSpec((9, 1, hw), lambda i: (0, 0, 0)),
            pl.BlockSpec(memory_space=smem),            # [b_eff, prelu_alpha]
        ],
        out_specs=pl.BlockSpec((1, c, hw), lambda i: (i, 0, 0)),
        compiler_params=pltpu.CompilerParams(
            dimension_semantics=("parallel",),
            vmem_limit_bytes=32 * 1024 * 1024,
        ),
    )(x_cm, pan_sa, lr_cm, dpatch, w_pan, w_eff, w_a_t, w_fc2,
      w_final, b_final, masks, scal)

    return out.reshape(b, c, h, w)             # NCHW via pure reshape


# -----------------------------------------------------------------------------
# Pure-JAX reference (mirrors the PyTorch forward, NCHW) for a sanity check
# -----------------------------------------------------------------------------
def reference(x, lr, pan, params):
    hp = lax.Precision.HIGHEST

    def conv(inp, wt, stride, pad):
        return lax.conv_general_dilated(
            inp, wt, (stride, stride), [(pad, pad), (pad, pad)],
            dimension_numbers=("NCHW", "OIHW", "NCHW"), precision=hp)

    b, c, h, w = x.shape
    q_s = conv(pan, params["w_pan"], 1, 0)
    k_s = jnp.mean(x, axis=(2, 3), keepdims=True)
    q_c = conv(lr, params["w_lr"], 1, 0)
    d_x = conv(x, params["w_down"], 4, 2) + params["b_down"][None, :, None, None]
    k_c = conv(d_x, params["w_spe"], 1, 0)
    _, _, h2, w2 = d_x.shape
    q_s_r = q_s.reshape(b, c, h * w).transpose(0, 2, 1)
    sa = jnp.matmul(q_s_r, k_s.reshape(b, c, 1), precision=hp).reshape(b, 1, h, w)
    q_c_r = q_c.reshape(b, c, h2 * w2)
    k_c_r = k_c.reshape(b, 1, h2 * w2).transpose(0, 2, 1)
    ca = jnp.matmul(q_c_r, k_c_r, precision=hp).reshape(b, c)
    y = jnp.matmul(ca, params["w_fc1"].T, precision=hp)
    y = jnp.where(y >= 0, y, params["prelu_alpha"][0] * y)
    y = jnp.matmul(y, params["w_fc2"].T, precision=hp)
    ca = jax.nn.sigmoid(y).reshape(b, c, 1, 1)
    sa = jax.nn.sigmoid(conv(sa, params["w_sa"], 1, 1))
    xg = sa * x
    xg = conv(xg, params["w_final"], 1, 1) + params["b_final"][None, :, None, None]
    return ca * xg


# -----------------------------------------------------------------------------
# Deterministic parameter init (PyTorch weight shape conventions, OIHW / (out,in))
# -----------------------------------------------------------------------------
def init_params(key, channel, reduction):
    ks = jax.random.split(key, 10)
    s = 0.1
    return {
        "w_pan": s * jax.random.normal(ks[0], (channel, 3, 1, 1), jnp.float32),
        "w_lr": s * jax.random.normal(ks[1], (channel, 32, 1, 1), jnp.float32),
        "w_spe": s * jax.random.normal(ks[2], (1, channel, 1, 1), jnp.float32),
        "w_down": s * jax.random.normal(ks[3], (channel, channel, 6, 6), jnp.float32),
        "b_down": s * jax.random.normal(ks[4], (channel,), jnp.float32),
        "w_fc1": s * jax.random.normal(ks[5], (channel // reduction, channel), jnp.float32),
        "prelu_alpha": jnp.array([0.25], jnp.float32),
        "w_fc2": s * jax.random.normal(ks[6], (channel, channel // reduction), jnp.float32),
        "w_sa": s * jax.random.normal(ks[7], (1, 1, 3, 3), jnp.float32),
        "w_final": s * jax.random.normal(ks[8], (channel, channel, 3, 3), jnp.float32),
        "b_final": s * jax.random.normal(ks[9], (channel,), jnp.float32),
    }


if __name__ == "__main__":
    key = jax.random.PRNGKey(0)
    kx, klr, kpan, kp = jax.random.split(key, 4)

    b, channel, reduction, h, w = 2, 32, 16, 16, 16
    h2 = w2 = (h + 4 - 6) // 4 + 1                 # conv_down output spatial = 4

    x = jax.random.normal(kx, (b, channel, h, w), jnp.float32)
    lr = jax.random.normal(klr, (b, 32, h2, w2), jnp.float32)
    pan = jax.random.normal(kpan, (b, 3, h, w), jnp.float32)
    params = init_params(kp, channel, reduction)

    out = jax.block_until_ready(jax.jit(awsca_forward)(x, lr, pan, params))
    assert out.shape == (b, channel, h, w)

    ref = jax.block_until_ready(reference(x, lr, pan, params))
    np.testing.assert_allclose(np.asarray(out), np.asarray(ref),
                               rtol=3e-2, atol=3e-2)
    print("KERNEL_OK")
</pallas_src>

<mosaic_0001>
module attributes {stable_mosaic.version = 11 : i64} {
  func.func @_awsca_fused_kernel(%arg0: i32, %arg1: memref<1x32x256xf32, #tpu.memory_space<vmem>>, %arg2: memref<1x3x256xf32, #tpu.memory_space<vmem>>, %arg3: memref<1x32x16xf32, #tpu.memory_space<vmem>>, %arg4: memref<1x16x1152xf32, #tpu.memory_space<vmem>>, %arg5: memref<32x3xf32, #tpu.memory_space<vmem>>, %arg6: memref<1x1152xf32, #tpu.memory_space<vmem>>, %arg7: memref<32x2xf32, #tpu.memory_space<vmem>>, %arg8: memref<32x2xf32, #tpu.memory_space<vmem>>, %arg9: memref<32x288xbf16, #tpu.memory_space<vmem>>, %arg10: memref<32x1xf32, #tpu.memory_space<vmem>>, %arg11: memref<9x1x256xf32, #tpu.memory_space<vmem>>, %arg12: memref<2xf32, #tpu.memory_space<smem>>, %arg13: memref<1x32x256xf32, #tpu.memory_space<vmem>>) attributes {dimension_semantics = [#tpu.dimension_semantics<parallel>], iteration_bounds = array<i64: 2>, scalar_prefetch = 0 : i64, scratch_operands = 0 : i64, tpu.core_type = #tpu.core_type<tc>, window_params = [{transform_indices = @transform_0, window_bounds = array<i64: 1, 32, 256>}, {transform_indices = @transform_1, window_bounds = array<i64: 1, 3, 256>}, {transform_indices = @transform_2, window_bounds = array<i64: 1, 32, 16>}, {transform_indices = @transform_3, window_bounds = array<i64: 1, 16, 1152>}, {pipeline_mode = #tpu.pipeline_mode<synchronous>, transform_indices = @transform_4, window_bounds = array<i64: 32, 3>}, {pipeline_mode = #tpu.pipeline_mode<synchronous>, transform_indices = @transform_5, window_bounds = array<i64: 1, 1152>}, {pipeline_mode = #tpu.pipeline_mode<synchronous>, transform_indices = @transform_6, window_bounds = array<i64: 32, 2>}, {pipeline_mode = #tpu.pipeline_mode<synchronous>, transform_indices = @transform_7, window_bounds = array<i64: 32, 2>}, {pipeline_mode = #tpu.pipeline_mode<synchronous>, transform_indices = @transform_8, window_bounds = array<i64: 32, 288>}, {pipeline_mode = #tpu.pipeline_mode<synchronous>, transform_indices = @transform_9, window_bounds = array<i64: 32, 1>}, {pipeline_mode = #tpu.pipeline_mode<synchronous>, transform_indices = @transform_10, window_bounds = array<i64: 9, 1, 256>}, {transform_indices = @transform_11, window_bounds = array<i64: 2>}, {transform_indices = @transform_12, window_bounds = array<i64: 1, 32, 256>}]} {
    %c0 = arith.constant 0 : index
    %c0_0 = arith.constant 0 : index
    %c0_1 = arith.constant 0 : index
    %0 = vector.load %arg1[%c0, %c0_0, %c0_1] : memref<1x32x256xf32, #tpu.memory_space<vmem>>, vector<1x32x256xf32>
    %1 = vector.shape_cast %0 : vector<1x32x256xf32> to vector<32x256xf32>
    %cst = arith.constant dense<0.000000e+00> : vector<32xf32>
    %2 = vector.multi_reduction <add>, %1, %cst [1] : vector<32x256xf32> to vector<32xf32>
    %3 = vector.shape_cast %2 : vector<32xf32> to vector<32x1xf32>
    %cst_2 = arith.constant 3.906250e-03 : f32
    %4 = vector.broadcast %cst_2 : f32 to vector<32x1xf32>
    %5 = arith.mulf %3, %4 : vector<32x1xf32>
    %c0_3 = arith.constant 0 : index
    %c0_4 = arith.constant 0 : index
    %6 = vector.load %arg5[%c0_3, %c0_4] : memref<32x3xf32, #tpu.memory_space<vmem>>, vector<32x3xf32>
    %c0_5 = arith.constant 0 : index
    %c0_6 = arith.constant 0 : index
    %c0_7 = arith.constant 0 : index
    %7 = vector.load %arg2[%c0_5, %c0_6, %c0_7] : memref<1x3x256xf32, #tpu.memory_space<vmem>>, vector<1x3x256xf32>
    %8 = vector.shape_cast %7 : vector<1x3x256xf32> to vector<3x256xf32>
    %cst_8 = arith.constant 0.000000e+00 : f32
    %9 = vector.broadcast %cst_8 : f32 to vector<1x256xf32>
    %10 = vector.extract_strided_slice %6 {offsets = [0, 0], sizes = [32, 1], strides = [1, 1]} : vector<32x3xf32> to vector<32x1xf32>
    %11 = arith.mulf %10, %5 : vector<32x1xf32>
    %12 = vector.shape_cast %11 : vector<32x1xf32> to vector<1x32x1xf32>
    %cst_9 = arith.constant dense<0.000000e+00> : vector<1xf32>
    %13 = vector.multi_reduction <add>, %12, %cst_9 [1, 2] : vector<1x32x1xf32> to vector<1xf32>
    %14 = vector.shape_cast %13 : vector<1xf32> to vector<1x1x1xf32>
    %15 = vector.extract %14[0, 0, 0] : f32 from vector<1x1x1xf32>
    %16 = vector.extract_strided_slice %8 {offsets = [0, 0], sizes = [1, 256], strides = [1, 1]} : vector<3x256xf32> to vector<1x256xf32>
    %17 = vector.broadcast %15 : f32 to vector<1x256xf32>
    %18 = arith.mulf %17, %16 : vector<1x256xf32>
    %19 = arith.addf %9, %18 : vector<1x256xf32>
    %20 = vector.extract_strided_slice %6 {offsets = [0, 1], sizes = [32, 1], strides = [1, 1]} : vector<32x3xf32> to vector<32x1xf32>
    %21 = arith.mulf %20, %5 : vector<32x1xf32>
    %22 = vector.shape_cast %21 : vector<32x1xf32> to vector<1x32x1xf32>
    %cst_10 = arith.constant dense<0.000000e+00> : vector<1xf32>
    %23 = vector.multi_reduction <add>, %22, %cst_10 [1, 2] : vector<1x32x1xf32> to vector<1xf32>
    %24 = vector.shape_cast %23 : vector<1xf32> to vector<1x1x1xf32>
    %25 = vector.extract %24[0, 0, 0] : f32 from vector<1x1x1xf32>
    %26 = vector.extract_strided_slice %8 {offsets = [1, 0], sizes = [1, 256], strides = [1, 1]} : vector<3x256xf32> to vector<1x256xf32>
    %27 = vector.broadcast %25 : f32 to vector<1x256xf32>
    %28 = arith.mulf %27, %26 : vector<1x256xf32>
    %29 = arith.addf %19, %28 : vector<1x256xf32>
    %30 = vector.extract_strided_slice %6 {offsets = [0, 2], sizes = [32, 1], strides = [1, 1]} : vector<32x3xf32> to vector<32x1xf32>
    %31 = arith.mulf %30, %5 : vector<32x1xf32>
    %32 = vector.shape_cast %31 : vector<32x1xf32> to vector<1x32x1xf32>
    %cst_11 = arith.constant dense<0.000000e+00> : vector<1xf32>
    %33 = vector.multi_reduction <add>, %32, %cst_11 [1, 2] : vector<1x32x1xf32> to vector<1xf32>
    %34 = vector.shape_cast %33 : vector<1xf32> to vector<1x1x1xf32>
    %35 = vector.extract %34[0, 0, 0] : f32 from vector<1x1x1xf32>
    %36 = vector.extract_strided_slice %8 {offsets = [2, 0], sizes = [1, 256], strides = [1, 1]} : vector<3x256xf32> to vector<1x256xf32>
    %37 = vector.broadcast %35 : f32 to vector<1x256xf32>
    %38 = arith.mulf %37, %36 : vector<1x256xf32>
    %39 = arith.addf %29, %38 : vector<1x256xf32>
    %40 = arith.negf %39 : vector<1x256xf32>
    %41 = math.exp %40 : vector<1x256xf32>
    %cst_12 = arith.constant 1.000000e+00 : f32
    %42 = vector.broadcast %cst_12 : f32 to vector<1x256xf32>
    %43 = arith.addf %42, %41 : vector<1x256xf32>
    %44 = arith.divf %42, %43 : vector<1x256xf32>
    %c0_13 = arith.constant 0 : index
    %45 = memref.load %arg12[%c0_13] : memref<2xf32, #tpu.memory_space<smem>>
    %c1 = arith.constant 1 : index
    %46 = memref.load %arg12[%c1] : memref<2xf32, #tpu.memory_space<smem>>
    %c0_14 = arith.constant 0 : index
    %c0_15 = arith.constant 0 : index
    %c0_16 = arith.constant 0 : index
    %47 = vector.load %arg3[%c0_14, %c0_15, %c0_16] : memref<1x32x16xf32, #tpu.memory_space<vmem>>, vector<1x32x16xf32>
    %48 = vector.shape_cast %47 : vector<1x32x16xf32> to vector<32x16xf32>
    %c0_17 = arith.constant 0 : index
    %c0_18 = arith.constant 0 : index
    %c0_19 = arith.constant 0 : index
    %49 = vector.load %arg4[%c0_17, %c0_18, %c0_19] : memref<1x16x1152xf32, #tpu.memory_space<vmem>>, vector<1x16x1152xf32>
    %50 = vector.shape_cast %49 : vector<1x16x1152xf32> to vector<16x1152xf32>
    %cst_20 = arith.constant dense<0.000000e+00> : vector<32x1152xf32>
    %51 = tpu.matmul %48, %50, %cst_20 {dimension_numbers = #tpu.dot_dimension_numbers<[1], [0], [0], [1], [0, 0, 1, 1], [], []>} : vector<32x16xf32>, vector<16x1152xf32>, vector<32x1152xf32> -> vector<32x1152xf32>
    %c0_21 = arith.constant 0 : index
    %c0_22 = arith.constant 0 : index
    %52 = vector.load %arg6[%c0_21, %c0_22] : memref<1x1152xf32, #tpu.memory_space<vmem>>, vector<1x1152xf32>
    %53 = vector.broadcast %52 : vector<1x1152xf32> to vector<32x1152xf32>
    %54 = arith.mulf %51, %53 : vector<32x1152xf32>
    %cst_23 = arith.constant dense<0.000000e+00> : vector<32xf32>
    %55 = vector.multi_reduction <add>, %54, %cst_23 [1] : vector<32x1152xf32> to vector<32xf32>
    %56 = vector.shape_cast %55 : vector<32xf32> to vector<32x1xf32>
    %cst_24 = arith.constant dense<0.000000e+00> : vector<32xf32>
    %57 = vector.multi_reduction <add>, %48, %cst_24 [1] : vector<32x16xf32> to vector<32xf32>
    %58 = vector.shape_cast %57 : vector<32xf32> to vector<32x1xf32>
    %59 = vector.broadcast %45 : f32 to vector<32x1xf32>
    %60 = arith.mulf %59, %58 : vector<32x1xf32>
    %61 = arith.addf %56, %60 : vector<32x1xf32>
    %c0_25 = arith.constant 0 : index
    %c0_26 = arith.constant 0 : index
    %62 = vector.load %arg7[%c0_25, %c0_26] : memref<32x2xf32, #tpu.memory_space<vmem>>, vector<32x2xf32>
    %c0_27 = arith.constant 0 : index
    %c0_28 = arith.constant 0 : index
    %63 = vector.load %arg8[%c0_27, %c0_28] : memref<32x2xf32, #tpu.memory_space<vmem>>, vector<32x2xf32>
    %cst_29 = arith.constant 0.000000e+00 : f32
    %64 = vector.broadcast %cst_29 : f32 to vector<32x1xf32>
    %65 = vector.extract_strided_slice %62 {offsets = [0, 0], sizes = [32, 1], strides = [1, 1]} : vector<32x2xf32> to vector<32x1xf32>
    %66 = arith.mulf %65, %61 : vector<32x1xf32>
    %67 = vector.shape_cast %66 : vector<32x1xf32> to vector<1x32x1xf32>
    %cst_30 = arith.constant dense<0.000000e+00> : vector<1xf32>
    %68 = vector.multi_reduction <add>, %67, %cst_30 [1, 2] : vector<1x32x1xf32> to vector<1xf32>
    %69 = vector.shape_cast %68 : vector<1xf32> to vector<1x1x1xf32>
    %70 = vector.extract %69[0, 0, 0] : f32 from vector<1x1x1xf32>
    %cst_31 = arith.constant 0.000000e+00 : f32
    %71 = arith.cmpf oge, %70, %cst_31 : f32
    %72 = arith.mulf %46, %70 : f32
    %73 = arith.select %71, %70, %72 : f32
    %74 = vector.extract_strided_slice %63 {offsets = [0, 0], sizes = [32, 1], strides = [1, 1]} : vector<32x2xf32> to vector<32x1xf32>
    %75 = vector.broadcast %73 : f32 to vector<32x1xf32>
    %76 = arith.mulf %75, %74 : vector<32x1xf32>
    %77 = arith.addf %64, %76 : vector<32x1xf32>
    %78 = vector.extract_strided_slice %62 {offsets = [0, 1], sizes = [32, 1], strides = [1, 1]} : vector<32x2xf32> to vector<32x1xf32>
    %79 = arith.mulf %78, %61 : vector<32x1xf32>
    %80 = vector.shape_cast %79 : vector<32x1xf32> to vector<1x32x1xf32>
    %cst_32 = arith.constant dense<0.000000e+00> : vector<1xf32>
    %81 = vector.multi_reduction <add>, %80, %cst_32 [1, 2] : vector<1x32x1xf32> to vector<1xf32>
    %82 = vector.shape_cast %81 : vector<1xf32> to vector<1x1x1xf32>
    %83 = vector.extract %82[0, 0, 0] : f32 from vector<1x1x1xf32>
    %cst_33 = arith.constant 0.000000e+00 : f32
    %84 = arith.cmpf oge, %83, %cst_33 : f32
    %85 = arith.mulf %46, %83 : f32
    %86 = arith.select %84, %83, %85 : f32
    %87 = vector.extract_strided_slice %63 {offsets = [0, 1], sizes = [32, 1], strides = [1, 1]} : vector<32x2xf32> to vector<32x1xf32>
    %88 = vector.broadcast %86 : f32 to vector<32x1xf32>
    %89 = arith.mulf %88, %87 : vector<32x1xf32>
    %90 = arith.addf %77, %89 : vector<32x1xf32>
    %91 = arith.negf %90 : vector<32x1xf32>
    %92 = math.exp %91 : vector<32x1xf32>
    %cst_34 = arith.constant 1.000000e+00 : f32
    %93 = vector.broadcast %cst_34 : f32 to vector<32x1xf32>
    %94 = arith.addf %93, %92 : vector<32x1xf32>
    %95 = arith.divf %93, %94 : vector<32x1xf32>
    %96 = vector.broadcast %44 : vector<1x256xf32> to vector<32x256xf32>
    %97 = arith.mulf %96, %1 : vector<32x256xf32>
    %c17_i32 = arith.constant 17 : i32
    %98 = tpu.dynamic_rotate %97 by %c17_i32 dim 1 : vector<32x256xf32>, i32 -> vector<32x256xf32>
    %c0_35 = arith.constant 0 : index
    %c0_36 = arith.constant 0 : index
    %c0_37 = arith.constant 0 : index
    %99 = vector.load %arg11[%c0_35, %c0_36, %c0_37] : memref<9x1x256xf32, #tpu.memory_space<vmem>>, vector<1x1x256xf32>
    %100 = vector.shape_cast %99 : vector<1x1x256xf32> to vector<1x256xf32>
    %101 = vector.broadcast %100 : vector<1x256xf32> to vector<32x256xf32>
    %102 = arith.mulf %98, %101 : vector<32x256xf32>
    %c16_i32 = arith.constant 16 : i32
    %103 = tpu.dynamic_rotate %97 by %c16_i32 dim 1 : vector<32x256xf32>, i32 -> vector<32x256xf32>
    %c1_38 = arith.constant 1 : index
    %c0_39 = arith.constant 0 : index
    %c0_40 = arith.constant 0 : index
    %104 = vector.load %arg11[%c1_38, %c0_39, %c0_40] : memref<9x1x256xf32, #tpu.memory_space<vmem>>, vector<1x1x256xf32>
    %105 = vector.shape_cast %104 : vector<1x1x256xf32> to vector<1x256xf32>
    %106 = vector.broadcast %105 : vector<1x256xf32> to vector<32x256xf32>
    %107 = arith.mulf %103, %106 : vector<32x256xf32>
    %c15_i32 = arith.constant 15 : i32
    %108 = tpu.dynamic_rotate %97 by %c15_i32 dim 1 : vector<32x256xf32>, i32 -> vector<32x256xf32>
    %c2 = arith.constant 2 : index
    %c0_41 = arith.constant 0 : index
    %c0_42 = arith.constant 0 : index
    %109 = vector.load %arg11[%c2, %c0_41, %c0_42] : memref<9x1x256xf32, #tpu.memory_space<vmem>>, vector<1x1x256xf32>
    %110 = vector.shape_cast %109 : vector<1x1x256xf32> to vector<1x256xf32>
    %111 = vector.broadcast %110 : vector<1x256xf32> to vector<32x256xf32>
    %112 = arith.mulf %108, %111 : vector<32x256xf32>
    %c1_i32 = arith.constant 1 : i32
    %113 = tpu.dynamic_rotate %97 by %c1_i32 dim 1 : vector<32x256xf32>, i32 -> vector<32x256xf32>
    %c3 = arith.constant 3 : index
    %c0_43 = arith.constant 0 : index
    %c0_44 = arith.constant 0 : index
    %114 = vector.load %arg11[%c3, %c0_43, %c0_44] : memref<9x1x256xf32, #tpu.memory_space<vmem>>, vector<1x1x256xf32>
    %115 = vector.shape_cast %114 : vector<1x1x256xf32> to vector<1x256xf32>
    %116 = vector.broadcast %115 : vector<1x256xf32> to vector<32x256xf32>
    %117 = arith.mulf %113, %116 : vector<32x256xf32>
    %c4 = arith.constant 4 : index
    %c0_45 = arith.constant 0 : index
    %c0_46 = arith.constant 0 : index
    %118 = vector.load %arg11[%c4, %c0_45, %c0_46] : memref<9x1x256xf32, #tpu.memory_space<vmem>>, vector<1x1x256xf32>
    %119 = vector.shape_cast %118 : vector<1x1x256xf32> to vector<1x256xf32>
    %120 = vector.broadcast %119 : vector<1x256xf32> to vector<32x256xf32>
    %121 = arith.mulf %97, %120 : vector<32x256xf32>
    %c255_i32 = arith.constant 255 : i32
    %122 = tpu.dynamic_rotate %97 by %c255_i32 dim 1 : vector<32x256xf32>, i32 -> vector<32x256xf32>
    %c5 = arith.constant 5 : index
    %c0_47 = arith.constant 0 : index
    %c0_48 = arith.constant 0 : index
    %123 = vector.load %arg11[%c5, %c0_47, %c0_48] : memref<9x1x256xf32, #tpu.memory_space<vmem>>, vector<1x1x256xf32>
    %124 = vector.shape_cast %123 : vector<1x1x256xf32> to vector<1x256xf32>
    %125 = vector.broadcast %124 : vector<1x256xf32> to vector<32x256xf32>
    %126 = arith.mulf %122, %125 : vector<32x256xf32>
    %c241_i32 = arith.constant 241 : i32
    %127 = tpu.dynamic_rotate %97 by %c241_i32 dim 1 : vector<32x256xf32>, i32 -> vector<32x256xf32>
    %c6 = arith.constant 6 : index
    %c0_49 = arith.constant 0 : index
    %c0_50 = arith.constant 0 : index
    %128 = vector.load %arg11[%c6, %c0_49, %c0_50] : memref<9x1x256xf32, #tpu.memory_space<vmem>>, vector<1x1x256xf32>
    %129 = vector.shape_cast %128 : vector<1x1x256xf32> to vector<1x256xf32>
    %130 = vector.broadcast %129 : vector<1x256xf32> to vector<32x256xf32>
    %131 = arith.mulf %127, %130 : vector<32x256xf32>
    %c240_i32 = arith.constant 240 : i32
    %132 = tpu.dynamic_rotate %97 by %c240_i32 dim 1 : vector<32x256xf32>, i32 -> vector<32x256xf32>
    %c7 = arith.constant 7 : index
    %c0_51 = arith.constant 0 : index
    %c0_52 = arith.constant 0 : index
    %133 = vector.load %arg11[%c7, %c0_51, %c0_52] : memref<9x1x256xf32, #tpu.memory_space<vmem>>, vector<1x1x256xf32>
    %134 = vector.shape_cast %133 : vector<1x1x256xf32> to vector<1x256xf32>
    %135 = vector.broadcast %134 : vector<1x256xf32> to vector<32x256xf32>
    %136 = arith.mulf %132, %135 : vector<32x256xf32>
    %c239_i32 = arith.constant 239 : i32
    %137 = tpu.dynamic_rotate %97 by %c239_i32 dim 1 : vector<32x256xf32>, i32 -> vector<32x256xf32>
    %c8 = arith.constant 8 : index
    %c0_53 = arith.constant 0 : index
    %c0_54 = arith.constant 0 : index
    %138 = vector.load %arg11[%c8, %c0_53, %c0_54] : memref<9x1x256xf32, #tpu.memory_space<vmem>>, vector<1x1x256xf32>
    %139 = vector.shape_cast %138 : vector<1x1x256xf32> to vector<1x256xf32>
    %140 = vector.broadcast %139 : vector<1x256xf32> to vector<32x256xf32>
    %141 = arith.mulf %137, %140 : vector<32x256xf32>
    %142 = tpu.concatenate %102, %107, %112, %117, %121, %126, %131, %136, %141 in 0 : vector<32x256xf32>, vector<32x256xf32>, vector<32x256xf32>, vector<32x256xf32>, vector<32x256xf32>, vector<32x256xf32>, vector<32x256xf32>, vector<32x256xf32>, vector<32x256xf32> -> vector<288x256xf32>
    %143 = arith.truncf %142 : vector<288x256xf32> to vector<288x256xbf16>
    %c0_55 = arith.constant 0 : index
    %c0_56 = arith.constant 0 : index
    %144 = vector.load %arg9[%c0_55, %c0_56] : memref<32x288xbf16, #tpu.memory_space<vmem>>, vector<32x288xbf16>
    %cst_57 = arith.constant dense<0.000000e+00> : vector<32x256xf32>
    %145 = tpu.matmul %144, %143, %cst_57 {dimension_numbers = #tpu.dot_dimension_numbers<[1], [0], [0], [1], [0, 0, 1, 1], [], []>} : vector<32x288xbf16>, vector<288x256xbf16>, vector<32x256xf32> -> vector<32x256xf32>
    %c0_58 = arith.constant 0 : index
    %c0_59 = arith.constant 0 : index
    %146 = vector.load %arg10[%c0_58, %c0_59] : memref<32x1xf32, #tpu.memory_space<vmem>>, vector<32x1xf32>
    %147 = vector.broadcast %146 : vector<32x1xf32> to vector<32x256xf32>
    %148 = arith.addf %145, %147 : vector<32x256xf32>
    %149 = vector.broadcast %95 : vector<32x1xf32> to vector<32x256xf32>
    %150 = arith.mulf %148, %149 : vector<32x256xf32>
    %c0_60 = arith.constant 0 : index
    %c0_61 = arith.constant 0 : index
    %c0_62 = arith.constant 0 : index
    %151 = vector.load %arg13[%c0_60, %c0_61, %c0_62] : memref<1x32x256xf32, #tpu.memory_space<vmem>>, vector<1x32x256xf32>
    %152 = vector.shape_cast %151 : vector<1x32x256xf32> to vector<32x256xf32>
    %153 = vector.shape_cast %150 : vector<32x256xf32> to vector<1x32x256xf32>
    tpu.vector_store %arg13[%c0_60, %c0_61, %c0_62], %153 {strides = array<i32>} : memref<1x32x256xf32, #tpu.memory_space<vmem>>, vector<1x32x256xf32>,
    return
  }
  func.func @transform_0(%arg0: i32) -> (i32, i32, i32) {
    %c0_i32 = arith.constant 0 : i32
    %c0_i32_0 = arith.constant 0 : i32
    %c0_i32_1 = arith.constant 0 : i32
    return %arg0, %c0_i32, %c0_i32_0 : i32, i32, i32
  }
  func.func @transform_1(%arg0: i32) -> (i32, i32, i32) {
    %c0_i32 = arith.constant 0 : i32
    %c0_i32_0 = arith.constant 0 : i32
    %c0_i32_1 = arith.constant 0 : i32
    return %arg0, %c0_i32, %c0_i32_0 : i32, i32, i32
  }
  func.func @transform_2(%arg0: i32) -> (i32, i32, i32) {
    %c0_i32 = arith.constant 0 : i32
    %c0_i32_0 = arith.constant 0 : i32
    %c0_i32_1 = arith.constant 0 : i32
    return %arg0, %c0_i32, %c0_i32_0 : i32, i32, i32
  }
  func.func @transform_3(%arg0: i32) -> (i32, i32, i32) {
    %c0_i32 = arith.constant 0 : i32
    %c0_i32_0 = arith.constant 0 : i32
    %c0_i32_1 = arith.constant 0 : i32
    return %arg0, %c0_i32, %c0_i32_0 : i32, i32, i32
  }
  func.func @transform_4(%arg0: i32) -> (i32, i32) {
    %c0_i32 = arith.constant 0 : i32
    %c0_i32_0 = arith.constant 0 : i32
    %c0_i32_1 = arith.constant 0 : i32
    return %c0_i32, %c0_i32_0 : i32, i32
  }
  func.func @transform_5(%arg0: i32) -> (i32, i32) {
    %c0_i32 = arith.constant 0 : i32
    %c0_i32_0 = arith.constant 0 : i32
    %c0_i32_1 = arith.constant 0 : i32
    return %c0_i32, %c0_i32_0 : i32, i32
  }
  func.func @transform_6(%arg0: i32) -> (i32, i32) {
    %c0_i32 = arith.constant 0 : i32
    %c0_i32_0 = arith.constant 0 : i32
    %c0_i32_1 = arith.constant 0 : i32
    return %c0_i32, %c0_i32_0 : i32, i32
  }
  func.func @transform_7(%arg0: i32) -> (i32, i32) {
    %c0_i32 = arith.constant 0 : i32
    %c0_i32_0 = arith.constant 0 : i32
    %c0_i32_1 = arith.constant 0 : i32
    return %c0_i32, %c0_i32_0 : i32, i32
  }
  func.func @transform_8(%arg0: i32) -> (i32, i32) {
    %c0_i32 = arith.constant 0 : i32
    %c0_i32_0 = arith.constant 0 : i32
    %c0_i32_1 = arith.constant 0 : i32
    return %c0_i32, %c0_i32_0 : i32, i32
  }
  func.func @transform_9(%arg0: i32) -> (i32, i32) {
    %c0_i32 = arith.constant 0 : i32
    %c0_i32_0 = arith.constant 0 : i32
    %c0_i32_1 = arith.constant 0 : i32
    return %c0_i32, %c0_i32_0 : i32, i32
  }
  func.func @transform_10(%arg0: i32) -> (i32, i32, i32) {
    %c0_i32 = arith.constant 0 : i32
    %c0_i32_0 = arith.constant 0 : i32
    %c0_i32_1 = arith.constant 0 : i32
    %c0_i32_2 = arith.constant 0 : i32
    return %c0_i32, %c0_i32_0, %c0_i32_1 : i32, i32, i32
  }
  func.func @transform_11(%arg0: i32) -> i32 {
    %c0_i32 = arith.constant 0 : i32
    %c0_i32_0 = arith.constant 0 : i32
    return %c0_i32 : i32
  }
  func.func @transform_12(%arg0: i32) -> (i32, i32, i32) {
    %c0_i32 = arith.constant 0 : i32
    %c0_i32_0 = arith.constant 0 : i32
    %c0_i32_1 = arith.constant 0 : i32
    return %arg0, %c0_i32, %c0_i32_0 : i32, i32, i32
  }
}

</mosaic_0001>

<bundles_post_ra>
// kernel: awsca_forward.1
= control target key start
LH: loop header
LB: loop body
LE: loop exit
PB: predicated region body
PF: predicated region fallthrough
CT: control target
= control target key end

     0   :  { %17 = vsyncpa [#allocation3], 0  ;;  %s2431_s21 = smov 0   ;;  %s3081_s0 = inlined_call_operand.vmem [shape: f32[2,32,256], index: 0, kind: input, shape index: {}]   ;;  %s3082_s1 = inlined_call_operand.vmem [shape: f32[2,3,256], index: 1, kind: input, shape index: {}]   ;;  %s3083_s2 = inlined_call_operand.vmem [shape: f32[2,32,16], index: 2, kind: input, shape index: {}]   ;;  %s3084_s3 = inlined_call_operand.vmem [shape: f32[2,16,1152], index: 3, kind: input, shape index: {}]   ;;  %s3085_s4 = inlined_call_operand.vmem [shape: f32[32,3], index: 4, kind: input, shape index: {}]   ;;  %s3086_s5 = inlined_call_operand.vmem [shape: f32[1,1152], index: 5, kind: input, shape index: {}]   ;;  %s3087_s6 = inlined_call_operand.vmem [shape: f32[32,2], index: 6, kind: input, shape index: {}]   ;;  %s3088_s7 = inlined_call_operand.vmem [shape: f32[32,2], index: 7, kind: input, shape index: {}]   ;;  %s3089_s8 = inlined_call_operand.vmem [shape: bf16[32,288], index: 8, kind: input, shape index: {}]   ;;  %s3090_s9 = inlined_call_operand.vmem [shape: f32[32,1], index: 9, kind: input, shape index: {}]   ;;  %s3091_s10 = inlined_call_operand.vmem [shape: f32[9,1,256], index: 10, kind: input, shape index: {}]   ;;  %s3092_s11 = inlined_call_operand.vmem [shape: f32[2], index: 11, kind: input, shape index: {}]   ;;  %s3093_s12 = inlined_call_operand.vmem [shape: f32[2,32,256], index: 12, kind: output, shape index: {}]  }
   0x1 LB: > { %s2137_s22 = sadd.s32 4294967295, %s2352_s21   ;;  %p2139_p0 = scmp.ge.s32.totalorder %s2352_s21, 1  ;;  %s2352_s21 = sphi %s2431_s21, %s23_s21  }
   0x2   : > { %p326_p1 = scmp.lt.s32.totalorder %s2352_s21, 3  ;;  %s360_s25 = sshll.u32 %s3092_s11, 4  ;;  %s361_s25 = int_to_ptr.vmem [resolvable:$true] %s360_s25 }
   0x3   : > { %p2275_p3 = scmp.eq.s32.totalorder %s2137_s22, 0  ;;  %s2327_s27 = scalar_lea.vmem %s361_s25, 16 }
   0x4   : > { %p2442_p2 = pnand %p2139_p0, %p326_p1  ;;  %p2328_p6 = scmp.ne.s32.totalorder %s361_s25, %s2327_s27 }
   0x5   : > { %p2335_p10 = scmp.lt.s32.totalorder %s361_s25, %s361_s25  ;;  %p2336_p11 = scmp.lt.s32.totalorder %s2327_s27, %s2327_s27 }
   0x6   : > { %p2271_p4 = pneg %p2442_p2 }
   0x7   : > { %p2337_p12 = por %p2336_p11, %p2335_p10 }
   0x8   : > { %p2272_p5 = pnand %p2275_p3, %p2271_p4 }
   0xa   : > { %p2329_p7 = pneg %p2272_p5 }
   0xc   : > { %p2330_p8 = pnand %p2329_p7, %p2328_p6 }
   0xe   : > { %p2331_p9 = pneg %p2330_p8 }
  0x10   : > { %p2338_p13 = pnand %p2337_p12, %p2331_p9 }
  0x12   : > { %2341 = shalt.err (!%p2338_p13)
}
  0x13   : > { %s2354_s28 = smov [#allocation2]   ;;  %405 = sbr.rel (%p2442_p2) target bundleno = 1200 (0x4b0), region = 68 }
  0x14   : > { %2274 = dma.vmem_to_smem (!%p2272_p5), %s361_s25, 16, %s2354_s28, [#allocation3]  }
  0x1a   : > { %2347 = dma.done.wait (%p2275_p3), [#allocation3], 16  }
  0x1b   : > { %2349 = vsyncadd (%p2275_p3), [#allocation3], 4294967280 }
  0x1c   : > { %411 = sfence }
  0x1d   : > { %p463_p0 = scmp.lt.s32.totalorder %s2137_s22, 1  ;;  %v2355_v0 = vmov 0.0   ;;  %vm646_vm0 = vcmask 130048   ;;  %v513_v44 = vld [vmem:[%s3085_s4] sm:$0xff]  ;;  %v514_v48 = vld [vmem:[%s3085_s4 + $0x8] sm:$0xff]  ;;  %v515_v54 = vld [vmem:[%s3085_s4 + $0x10] sm:$0xff] }
  0x1e   : > { %723 = vmatprep.mubr.f32.mxu0 %v2355_v0  ;;  %990 = vmatprep.mubr.f32.mxu1 %v2355_v0  ;;  %v516_v58 = vld [vmem:[%s3085_s4 + $0x18] sm:$0xff]  ;;  %vm522_vm1 = vcmask 7168   ;;  %s2358_s26 = smov 17   ;;  %s2359_s27 = smov 16   ;;  %vm1885_vm10 = vcmask 261120  }
  0x1f   : > { %s3096_s22 = smov (!%p463_p0, %s2137_s22), 1  ;;  %s2360_s28 = smov 15  }
  0x20   : > { %s2200_s29 = sshll.u32 %s3096_s22, 6  ;;  %s2256_s30 = smul.u32 144, %s3096_s22 }
  0x21   : > { %s467_s15 = scalar_lea.vmem %s3081_s0, %s2200_s29  ;;  %s2202_s19 = sshll.u32 %s3096_s22, 5 }
  0x22   : > { %s2467_s18 = scalar_lea.vmem %s3084_s3, %s2256_s30  ;;  %v2469_v1 = vld [vmem:[%s467_s15] sm:$0xff]  ;;  %v2471_v2 = vld [vmem:[%s467_s15 + $0x8] sm:$0xff]  ;;  %v2479_v6 = vld [vmem:[%s467_s15 + $0x10] sm:$0xff]  ;;  %s2501_s24 = scalar_lea.vmem %s3083_s2, %s2202_s19 }
  0x23   : > { %v2473_v3 = vld [vmem:[%s467_s15 + $0x20] sm:$0xff]  ;;  %v497_v4 = vadd.f32 %v2471_v2, %v2469_v1  ;;  %v2477_v5 = vld [vmem:[%s467_s15 + $0x28] sm:$0xff]  ;;  %v2481_v7 = vld [vmem:[%s467_s15 + $0x18] sm:$0xff]  ;;  %s2356_s30 = smov 127   ;;  %s2201_s17 = sshll.u32 %s3096_s22, 3 }
  0x24   : > { %v503_v8 = vadd.f32 %v2477_v5, %v2473_v3  ;;  %v2486_v9 = vld [vmem:[%s467_s15 + $0x30] sm:$0xff]  ;;  %v2488_v10 = vld [vmem:[%s467_s15 + $0x38] sm:$0xff]  ;;  %v629_v11 = vld [vmem:[%s2467_s18 + $0x8] sm:$0xff]  ;;  %v500_v12 = vadd.f32 %v2481_v7, %v2479_v6  ;;  %s2357_s15 = smov 126   ;;  %s472_s20 = scalar_lea.vmem %s3082_s1, %s2201_s17 }
  0x25   : > { %498 = vadd.xlane.f32.xlu0 %v497_v4  ;;  %v638_v13 = vld [vmem:[%s2467_s18 + $0x50] sm:$0xff]  ;;  %v628_v14 = vld [vmem:[%s2467_s18] sm:$0xff]  ;;  %v637_v15 = vld [vmem:[%s2467_s18 + $0x48] sm:$0xff]  ;;  %v506_v16 = vadd.f32 %v2488_v10, %v2486_v9  ;;  %s2361_s13 = smov 1   ;;  %s2362_s14 = smov 113  }
  0x26   : > { %504 = vadd.xlane.f32.xlu1 %v503_v8  ;;  %v2220_v17 = vpack.c.bf16 %v638_v13, %v629_v11  ;;  %v2222_v18 = vpack.c.bf16 %v637_v15, %v628_v14  ;;  %v631_v19 = vld [vmem:[%s2467_s18 + $0x18] sm:$0xff]  ;;  %v640_v20 = vld [vmem:[%s2467_s18 + $0x60] sm:$0xff]  ;;  %v630_v22 = vld [vmem:[%s2467_s18 + $0x10] sm:$0xff]  ;;  %v1104_v11 = vlaneseq  ;;  %s2364_s16 = smov 111   ;;  %s3036_s19 = sld [smem:[#allocation2 + $0x1]] }
  0x27   : > { %v2224_v21 = vpack.c.bf16 %v640_v20, %v631_v19  ;;  %v639_v23 = vld [vmem:[%s2467_s18 + $0x58] sm:$0xff]  ;;  %v633_v24 = vld [vmem:[%s2467_s18 + $0x28] sm:$0xff]  ;;  %v2509_v25 = vld [vmem:[%s2501_s24] sm:$0xff] }
  0x28   : > { %2221 = vmatprep.subr.bf16.mxu0 %v2220_v17  ;;  %v2226_v26 = vpack.c.bf16 %v639_v23, %v630_v22  ;;  %v642_v27 = vld [vmem:[%s2467_s18 + $0x70] sm:$0xff]  ;;  %v635_v29 = vld [vmem:[%s2467_s18 + $0x38] sm:$0xff]  ;;  %v644_v30 = vld [vmem:[%s2467_s18 + $0x80] sm:$0xff] }
  0x29   : > { %501 = vadd.xlane.f32.xlu0 %v500_v12  ;;  %2223 = vmatpush1.bf16.msra.mxu0 %v2222_v18  ;;  %v2228_v28 = vpack.c.bf16 %v642_v27, %v633_v24  ;;  %v634_v31 = vld [vmem:[%s2467_s18 + $0x30] sm:$0xff]  ;;  %v2232_v32 = vpack.c.bf16 %v644_v30, %v635_v29  ;;  %v643_v33 = vld [vmem:[%s2467_s18 + $0x78] sm:$0xff]  ;;  %v2520_v35 = vld [vmem:[%s2501_s24 + $0x8] sm:$0xff]  ;;  %v2604_v12 = vshrl.u32 %v1104_v11, 7 }
  0x2a   : > { %507 = vadd.xlane.f32.xlu1 %v506_v16  ;;  %2225 = vmatprep.subr.bf16.mxu0 %v2224_v21  ;;  %v2234_v34 = vpack.c.bf16 %v643_v33, %v634_v31  ;;  %v2526_v36 = vld [vmem:[%s2501_s24 + $0x10] sm:$0xff]  ;;  %v2535_v37 = vld [vmem:[%s2501_s24 + $0x18] sm:$0xff]  ;;  %v632_v38 = vld [vmem:[%s2467_s18 + $0x20] sm:$0xff]  ;;  %s622_s24 = sld [smem:[#allocation2]] }
  0x2b   : > { %2233 = vmatprep.subr.bf16.mxu1 %v2232_v32  ;;  %v641_v39 = vld [vmem:[%s2467_s18 + $0x68] sm:$0xff]  ;;  %v636_v40 = vld [vmem:[%s2467_s18 + $0x40] sm:$0xff]  ;;  %v2607_v13 = vsub.s32 0, %v2604_v12  ;;  %v2615_v15 = vsub.s32 1, %v2604_v12 }
  0x2c   : > { %2157 = vmatmul.mubr.msk.f32.vlgmr.msra.gmra.mrb[0].mxu0 %vm646_vm0, %v2509_v25  ;;  %2235 = vmatpush1.bf16.msra.mxu1 %v2234_v34  ;;  %v645_v41 = vld [vmem:[%s2467_s18 + $0x88] sm:$0xff]  ;;  %v2230_v42 = vpack.c.bf16 %v641_v39, %v632_v38  ;;  %v2612_v14 = vld [vmem:[%s3086_s5] sm:$0xff]  ;;  %v1114_v39 = vsub.s32 2, %v2604_v12 }
  0x2d   : > { %729 = vmatprep.mubr.f32.mxu0 %v2355_v0  ;;  %2227 = vmatpush1.bf16.msra.mxu0 %v2226_v26  ;;  %v2236_v43 = vpack.c.bf16 %v645_v41, %v636_v40  ;;  %v1107_v16 = vrot.slane %v2612_v14, %v2607_v13  ;;  %v1111_v18 = vrot.slane %v2612_v14, %v2615_v15 }
  0x2e   : > { %2229 = vmatprep.subr.bf16.mxu0 %v2228_v28 }
  0x2f   : > { %2169 = vmatmul.mubr.msk.f32.vlgmr.msra.gmra.mrb[0].mxu1 %vm646_vm0, %v2509_v25 }
  0x30   : > { %2158 = vmatmul.mubr.msk.f32.gmra.mrb[2].mxu0 %vm646_vm0, %v2520_v35  ;;  %996 = vmatprep.mubr.f32.mxu1 %v2355_v0 }
  0x31   : > { %735 = vmatprep.mubr.f32.mxu0 %v2355_v0 }
  0x33   : > { %2170 = vmatmul.mubr.msk.f32.gmra.mrb[2].mxu1 %vm646_vm0, %v2520_v35 }
  0x34   : > { %2159 = vmatmul.mubr.msk.f32.gmra.mrb[4].mxu0 %vm646_vm0, %v2526_v36  ;;  %1002 = vmatprep.mubr.f32.mxu1 %v2355_v0 }
  0x35   : > { %741 = vmatprep.mubr.f32.mxu0 %v2355_v0 }
  0x37   : > { %2171 = vmatmul.mubr.msk.f32.gmra.mrb[4].mxu1 %vm646_vm0, %v2526_v36 }
  0x38   : > { %2160 = vmatmul.mubr.msk.f32.gmra.mrb[6].mxu0 %vm646_vm0, %v2535_v37  ;;  %1008 = vmatprep.mubr.f32.mxu1 %v2355_v0 }
  0x39   : > { %812 = vmatprep.mubr.f32.mxu0 %v2355_v0 }
  0x3b   : > { %2172 = vmatmul.mubr.msk.f32.gmra.mrb[6].mxu1 %vm646_vm0, %v2535_v37 }
  0x3c   : > { %2161 = vmatmul.mubr.msk.f32.vlgmr.msra.gmra.mrb[8].mxu0 %vm646_vm0, %v2509_v25 }
  0x3d   : > { %818 = vmatprep.mubr.f32.mxu0 %v2355_v0  ;;  %2231 = vmatpush1.bf16.msra.mxu0 %v2230_v42 }
  0x3e   : > { %2237 = vmatprep.subr.bf16.mxu0 %v2236_v43 }
  0x40   : > { %2162 = vmatmul.mubr.msk.f32.gmra.mrb[10].mxu0 %vm646_vm0, %v2520_v35 }
  0x41   : > { %824 = vmatprep.mubr.f32.mxu0 %v2355_v0 }
  0x44   : > { %2163 = vmatmul.mubr.msk.f32.gmra.mrb[12].mxu0 %vm646_vm0, %v2526_v36 }
  0x45   : > { %830 = vmatprep.mubr.f32.mxu0 %v2355_v0 }
  0x48   : > { %2164 = vmatmul.mubr.msk.f32.gmra.mrb[14].mxu0 %vm646_vm0, %v2535_v37 }
  0x49   : > { %901 = vmatprep.mubr.f32.mxu0 %v2355_v0 }
  0x4c   : > { %2165 = vmatmul.mubr.msk.f32.vlgmr.msra.gmra.mrb[16].mxu0 %vm646_vm0, %v2509_v25 }
  0x4d   : > { %907 = vmatprep.mubr.f32.mxu0 %v2355_v0  ;;  %2239 = vmatpush3.bf16.msra.mxu0 %v2236_v43  ;;  %v1118_v43 = vsub.s32 3, %v2604_v12 }
  0x50   : > { %2166 = vmatmul.mubr.msk.f32.gmra.mrb[18].mxu0 %vm646_vm0, %v2520_v35 }
  0x51   : > { %913 = vmatprep.mubr.f32.mxu0 %v2355_v0 }
  0x54   : > { %2167 = vmatmul.mubr.msk.f32.gmra.mrb[20].mxu0 %vm646_vm0, %v2526_v36 }
  0x55   : > { %919 = vmatprep.mubr.f32.mxu0 %v2355_v0 }
  0x58   : > { %2168 = vmatmul.mubr.msk.f32.gmra.mrb[22].mxu0 %vm646_vm0, %v2535_v37 }
  0x59   : > { %2214 = vmatprep.mubr.msk.f32.mxu0 %vm646_vm0, %v2509_v25 }
  0x5c   : > { %2215 = vmatmul.mubr.msk.f32.vlgmr.msra.gmra.mrb[24].mxu0 %vm646_vm0, %v2520_v35 }
  0x5d   : > { %2217 = vmatprep.mubr.msk.f32.mxu0 %vm646_vm0, %v2526_v36 }
  0x60   : > { %2218 = vmatmul.mubr.msk.f32.gmra.mrb[26].mxu0 %vm646_vm0, %v2535_v37 }
  0xb2   : > { %v499_v45 = vpop.xlane.xlu0 %498 }
  0xb3   : > { %v509_v46 = vmul.f32 0.00390625, %v499_v45  ;;  %v505_v51 = vpop.xlane.xlu1 %504 }
  0xb4   : > { %v511_v52 = vmul.f32 0.00390625, %v505_v51 }
  0xb5   : > { %v518_v47 = vmul.f32 %v513_v44, %v509_v46 }
  0xb6   : > { %v502_v49 = vpop.xlane.xlu0 %501  ;;  %v520_v55 = vmul.f32 %v515_v54, %v511_v52  ;;  %v1119_v52 = vrot.slane %v2612_v14, %v1118_v43 }
  0xb7   : > { %v510_v50 = vmul.f32 0.00390625, %v502_v49  ;;  %546 = vrot.lane.b32.xlu0 %v518_v47, %s2356_s30  ;;  %v508_v56 = vpop.xlane.xlu1 %507  ;;  %v523_v61 = vsel %vm522_vm1, %v518_v47, 0.0 }
  0xb8   : > { %v512_v57 = vmul.f32 0.00390625, %v508_v56  ;;  %v526_v63 = vsel %vm522_vm1, %v520_v55, 0.0 }
  0xb9   : > { %v519_v53 = vmul.f32 %v514_v48, %v510_v50  ;;  %v1115_v48 = vrot.slane %v2612_v14, %v1114_v39 }
  0xba   : > { %v521_v59 = vmul.f32 %v516_v58, %v512_v57 }
  0xbb   : > { %583 = vrot.lane.b32.xlu0 %v519_v53, %s2357_s15  ;;  %548 = vrot.lane.b32.xlu1 %v519_v53, %s2356_s30  ;;  %v524_v60 = vsel %vm522_vm1, %v519_v53, 0.0 }
  0xbc   : > { %v525_v62 = vadd.f32 %v524_v60, %v523_v61  ;;  %v528_v4 = vsel %vm522_vm1, %v521_v59, 0.0 }
  0xbe   : > { %v527_v0 = vadd.f32 %v526_v63, %v525_v62 }
  0xbf   : > { %585 = vrot.lane.b32.xlu0 %v520_v55, %s2357_s15  ;;  %550 = vrot.lane.b32.xlu1 %v520_v55, %s2356_s30 }
  0xc0   : > { %v529_v8 = vadd.f32 %v528_v4, %v527_v0 }
  0xc3   : > { %581 = vrot.lane.b32.xlu1 %v518_v47, %s2357_s15 }
  0xc7   : > { %552 = vrot.lane.b32.xlu1 %v521_v59, %s2356_s30 }
  0xcb   : > { %587 = vrot.lane.b32.xlu1 %v521_v59, %s2357_s15  ;;  %s2363_s15 = smov 112  }
  0xde   : > { %530 = vadd.xlane.f32.xlu0 %v529_v8 }
  0xff   : > { %v725_v17 = vpop.f32.mrb[0].mxu0 }
 0x100   : > { %v1149_v19 = vmul.f32 %v1107_v16, %v725_v17  ;;  %v727_v20 = vpop.f32.mrb[1].mxu0 }
 0x101   : > { %v1150_v21 = vmul.f32 %v1111_v18, %v727_v20  ;;  %v1122_v20 = vsub.s32 4, %v2604_v12 }
 0x102   : > { %v992_v28 = vpop.f32.mrb[0].mxu1 }
 0x103   : > { %v1185_v22 = vadd.f32 %v1150_v21, %v1149_v19  ;;  %v731_v23 = vpop.f32.mrb[2].mxu0  ;;  %v2621_v29 = vpop.f32.mrb[1].mxu1 }
 0x104   : > { %v1158_v24 = vmul.f32 %v1107_v16, %v731_v23  ;;  %v733_v26 = vpop.f32.mrb[3].mxu0  ;;  %v1126_v23 = vsub.s32 5, %v2604_v12 }
 0x105   : > { %v1159_v27 = vmul.f32 %v1111_v18, %v733_v26 }
 0x106   : > { %v998_v38 = vpop.f32.mrb[2].mxu1  ;;  %v1127_v39 = vrot.slane %v2612_v14, %v1126_v23 }
 0x107   : > { %v1195_v30 = vadd.f32 %v1159_v27, %v1158_v24  ;;  %v737_v31 = vpop.f32.mrb[4].mxu0  ;;  %v2624_v40 = vpop.f32.mrb[3].mxu1  ;;  %v1130_v27 = vsub.s32 6, %v2604_v12 }
 0x108   : > { %v1167_v32 = vmul.f32 %v1107_v16, %v737_v31  ;;  %v739_v33 = vpop.f32.mrb[5].mxu0 }
 0x109   : > { %v1168_v34 = vmul.f32 %v1111_v18, %v739_v33  ;;  %v1134_v33 = vsub.s32 7, %v2604_v12 }
 0x10a   : > { %v2627_v47 = vpop.f32.mrb[4].mxu1 }
 0x10b   : > { %v1205_v41 = vadd.f32 %v1168_v34, %v1167_v32  ;;  %v743_v42 = vpop.f32.mrb[6].mxu0  ;;  %v2630_v49 = vpop.f32.mrb[5].mxu1 }
 0x10c   : > { %v1176_v44 = vmul.f32 %v1107_v16, %v743_v42  ;;  %v745_v45 = vpop.f32.mrb[7].mxu0 }
 0x10d   : > { %v1177_v46 = vmul.f32 %v1111_v18, %v745_v45 }
 0x10e   : > { %v2633_v56 = vpop.f32.mrb[6].mxu1 }
 0x10f   : > { %v1215_v50 = vadd.f32 %v1177_v46, %v1176_v44  ;;  %v814_v51 = vpop.f32.mrb[8].mxu0  ;;  %v2635_v58 = vpop.f32.mrb[7].mxu1  ;;  %v1131_v44 = vrot.slane %v2612_v14, %v1130_v27 }
 0x110   : > { %v1151_v53 = vmul.f32 %v1115_v48, %v814_v51  ;;  %v816_v54 = vpop.f32.mrb[9].mxu0  ;;  %v1135_v51 = vrot.slane %v2612_v14, %v1134_v33 }
 0x111   : > { %v1152_v55 = vmul.f32 %v1119_v52, %v816_v54 }
 0x112   : > { %v1186_v57 = vadd.f32 %v1185_v22, %v1151_v53 }
 0x113   : > { %v820_v59 = vpop.f32.mrb[10].mxu0 }
 0x114   : > { %v1187_v60 = vadd.f32 %v1186_v57, %v1152_v55  ;;  %v1160_v61 = vmul.f32 %v1115_v48, %v820_v59  ;;  %v822_v62 = vpop.f32.mrb[11].mxu0  ;;  %v1156_v55 = vmul.f32 %v1135_v51, %v2621_v29 }
 0x115   : > { %v1161_v63 = vmul.f32 %v1119_v52, %v822_v62  ;;  %v1164_v62 = vmul.f32 %v1131_v44, %v998_v38 }
 0x116   : > { %v1196_v0 = vadd.f32 %v1195_v30, %v1160_v61  ;;  %v1123_v30 = vrot.slane %v2612_v14, %v1122_v20 }
 0x117   : > { %v826_v4 = vpop.f32.mrb[12].mxu0 }
 0x118   : > { %v1197_v8 = vadd.f32 %v1196_v0, %v1161_v63  ;;  %v1169_v16 = vmul.f32 %v1115_v48, %v826_v4  ;;  %v828_v17 = vpop.f32.mrb[13].mxu0 }
 0x119   : > { %v1170_v18 = vmul.f32 %v1119_v52, %v828_v17 }
 0x11a   : > { %v1206_v19 = vadd.f32 %v1205_v41, %v1169_v16 }
 0x11b   : > { %v832_v21 = vpop.f32.mrb[14].mxu0 }
 0x11c   : > { %v1207_v22 = vadd.f32 %v1206_v19, %v1170_v18  ;;  %v1178_v24 = vmul.f32 %v1115_v48, %v832_v21  ;;  %v834_v26 = vpop.f32.mrb[15].mxu0  ;;  %v1155_v48 = vmul.f32 %v1131_v44, %v992_v28  ;;  %v1173_v19 = vmul.f32 %v1131_v44, %v2627_v47 }
 0x11d   : > { %v1179_v31 = vmul.f32 %v1119_v52, %v834_v26 }
 0x11e   : > { %v1216_v32 = vadd.f32 %v1215_v50, %v1178_v24 }
 0x11f   : > { %v903_v34 = vpop.f32.mrb[16].mxu0 }
 0x120   : > { %v1217_v41 = vadd.f32 %v1216_v32, %v1179_v31  ;;  %v1153_v42 = vmul.f32 %v1123_v30, %v903_v34  ;;  %v905_v43 = vpop.f32.mrb[17].mxu0  ;;  %v2177_v32 = vld [vmem:[%s3086_s5 + $0x8] ss:$0 sm:$0xff] }
 0x121   : > { %v1154_v45 = vmul.f32 %v1127_v39, %v905_v43 }
 0x122   : > { %v1188_v46 = vadd.f32 %v1187_v60, %v1153_v42  ;;  %v1165_v60 = vmul.f32 %v1135_v51, %v2624_v40 }
 0x123   : > { %v909_v50 = vpop.f32.mrb[18].mxu0 }
 0x124   : > { %v1189_v52 = vadd.f32 %v1188_v46, %v1154_v45  ;;  %v1162_v53 = vmul.f32 %v1123_v30, %v909_v50  ;;  %v911_v54 = vpop.f32.mrb[19].mxu0 }
 0x125   : > { %v1163_v57 = vmul.f32 %v1127_v39, %v911_v54 }
 0x126   : > { %v1198_v59 = vadd.f32 %v1197_v8, %v1162_v53  ;;  %v1190_v61 = vadd.f32 %v1189_v52, %v1155_v48  ;;  %v1174_v8 = vmul.f32 %v1135_v51, %v2630_v49 }
 0x127   : > { %v915_v63 = vpop.f32.mrb[20].mxu0 }
 0x128   : > { %v1199_v0 = vadd.f32 %v1198_v59, %v1163_v57  ;;  %v1171_v4 = vmul.f32 %v1123_v30, %v915_v63  ;;  %v917_v16 = vpop.f32.mrb[21].mxu0  ;;  %v1191_v17 = vadd.f32 %v1190_v61, %v1156_v55 }
 0x129   : > { %v1172_v28 = vmul.f32 %v1127_v39, %v917_v16  ;;  %v547_v38 = vpop.permute.xlu0 %546 }
 0x12a   : > { %v1208_v18 = vadd.f32 %v1207_v22, %v1171_v4  ;;  %v1200_v14 = vadd.f32 %v1199_v0, %v1164_v62  ;;  %v1182_v22 = vmul.f32 %v1131_v44, %v2633_v56  ;;  %v558_v59 = vsel %vm522_vm1, %v547_v38, 0.0 }
 0x12b   : > { %v921_v21 = vpop.f32.mrb[22].mxu0  ;;  %v1228_v38 = vsel %vm646_vm0, %v2520_v35, 0.0 }
 0x12c   : > { %v1209_v23 = vadd.f32 %v1208_v18, %v1172_v28  ;;  %v1180_v24 = vmul.f32 %v1123_v30, %v921_v21  ;;  %v1201_v29 = vadd.f32 %v1200_v14, %v1165_v60  ;;  %v923_v26 = vpop.f32.mrb[23].mxu0  ;;  %v1183_v30 = vmul.f32 %v1135_v51, %v2635_v58 }
 0x12d   : > { %v549_v27 = vpop.permute.xlu1 %548  ;;  %v1181_v31 = vmul.f32 %v1127_v39, %v923_v26  ;;  %v584_v39 = vpop.permute.xlu0 %583  ;;  %v1225_v26 = vsel %vm646_vm0, %v2509_v25, 0.0 }
 0x12e   : > { %v1218_v40 = vadd.f32 %v1217_v41, %v1180_v24  ;;  %v1210_v33 = vadd.f32 %v1209_v23, %v1173_v19  ;;  %v559_v54 = vsel %vm522_vm1, %v549_v27, 0.0  ;;  %v594_v0 = vsel %vm522_vm1, %v584_v39, 0.0 }
 0x12f   : > { %v2216_v34 = vpop.f32.mrb[24].mxu0  ;;  %v560_v62 = vadd.f32 %v559_v54, %v558_v59  ;;  %v1231_v24 = vsel %vm646_vm0, %v2526_v36, 0.0 }
 0x130   : > { %v1219_v47 = vadd.f32 %v1218_v40, %v1181_v31  ;;  %v1211_v42 = vadd.f32 %v1210_v33, %v1174_v8  ;;  %v1166_v43 = vmul.f32 %v2216_v34, %v2177_v32  ;;  %v1081_v45 = vpop.f32.mrb[25].mxu0  ;;  %v1234_v8 = vsel %vm646_vm0, %v2535_v37, 0.0 }
 0x131   : > { %v551_v46 = vpop.permute.xlu1 %550  ;;  %v1157_v49 = vmul.f32 %v2177_v32, %v1081_v45  ;;  %v586_v16 = vpop.permute.xlu0 %585 }
 0x132   : > { %v1220_v48 = vadd.f32 %v1219_v47, %v1182_v22  ;;  %v1202_v50 = vadd.f32 %v1201_v29, %v1166_v43  ;;  %v561_v61 = vsel %vm522_vm1, %v551_v46, 0.0  ;;  %v596_v14 = vsel %vm522_vm1, %v586_v16, 0.0  ;;  %v1249_v16 = vld [vmem:[%s3087_s6 + $0x18] sm:$0xff] }
 0x133   : > { %v2219_v52 = vpop.f32.mrb[26].mxu0  ;;  %v1192_v53 = vadd.f32 %v1191_v17, %v1157_v49  ;;  %v562_v4 = vadd.f32 %v561_v61, %v560_v62 }
 0x134   : > { %v1221_v41 = vadd.f32 %v1220_v48, %v1183_v30  ;;  %v1184_v55 = vmul.f32 %v2219_v52, %v2177_v32  ;;  %v1091_v57 = vpop.f32.mrb[27].mxu0  ;;  %v1237_v30 = vstv %s622_s24 }
 0x135   : > { %v582_v56 = vpop.permute.xlu1 %581  ;;  %v1175_v44 = vmul.f32 %v2177_v32, %v1091_v57 }
 0x136   : > { %v593_v58 = vsel %vm522_vm1, %v582_v56, 0.0  ;;  %v1222_v51 = vadd.f32 %v1221_v41, %v1184_v55  ;;  %v1246_v55 = vld [vmem:[%s3087_s6] sm:$0xff] }
 0x137   : > { %v1212_v63 = vadd.f32 %v1211_v42, %v1175_v44  ;;  %v595_v17 = vadd.f32 %v594_v0, %v593_v58 }
 0x139   : > { %v553_v60 = vpop.permute.xlu1 %552  ;;  %v597_v21 = vadd.f32 %v596_v14, %v595_v17  ;;  %v1248_v14 = vld [vmem:[%s3087_s6 + $0x10] sm:$0xff] }
 0x13a   : > { %v563_v28 = vsel %vm522_vm1, %v553_v60, 0.0 }
 0x13b   : > { %v564_v18 = vadd.f32 %v563_v28, %v562_v4 }
 0x13d   : > { %v588_v19 = vpop.permute.xlu1 %587  ;;  %565 = vadd.xlane.f32.xlu1 %v564_v18 }
 0x13e   : > { %v598_v23 = vsel %vm522_vm1, %v588_v19, 0.0 }
 0x13f   : > { %v599_v29 = vadd.f32 %v598_v23, %v597_v21 }
 0x141   : > { %600 = vadd.xlane.f32.xlu0 %v599_v29  ;;  %1232 = vadd.xlane.f32.xlu1 %v1231_v24 }
 0x145   : > { %1226 = vadd.xlane.f32.xlu0 %v1225_v26  ;;  %1235 = vadd.xlane.f32.xlu1 %v1234_v8 }
 0x149   : > { %1229 = vadd.xlane.f32.xlu0 %v1228_v38  ;;  %1193 = vadd.xlane.f32.xlu1 %v1192_v53 }
 0x14d   : > { %1203 = vadd.xlane.f32.xlu0 %v1202_v50 }
 0x151   : > { %1223 = vadd.xlane.f32.xlu0 %v1222_v51  ;;  %v1247_v51 = vld [vmem:[%s3087_s6 + $0x8] sm:$0xff] }
 0x155   : > { %1213 = vadd.xlane.f32.xlu0 %v1212_v63 }
 0x16b   : > { %v531_v36 = vpop.xlane.xlu0 %530 }
 0x16c   : > { %v532_v27 = vrot.slane %v531_v36, 4 }
 0x16e   : > { %v533_v31 = vadd.f32 %v532_v27, %v531_v36 }
 0x170   : > { %v534_v32 = vrot.slane %v533_v31, 2 }
 0x172   : > { %v535_v40 = vadd.f32 %v534_v32, %v533_v31  ;;  %v517_v31 = vld [vmem:[%s472_s20] sm:$0x77] }
 0x174   : > { %v536_v33 = vrot.slane %v535_v40, 1 }
 0x176   : > { %v537_v25 = vadd.f32 %v536_v33, %v535_v40 }
 0x178   : > { %2257 = vpush %v537_v25 }
 0x1a9   : > { %s2258_s23 = spop %2257 }
 0x1aa   : > { %v539_v33 = vstv %s2258_s23 }
 0x1ca   : > { %v566_v37 = vpop.xlane.xlu1 %565 }
 0x1cb   : > { %v567_v22 = vrot.slane %v566_v37, 4 }
 0x1cd   : > { %v568_v34 = vadd.f32 %v567_v22, %v566_v37  ;;  %v540_v22 = vmul.f32 %v539_v33, %v517_v31 }
 0x1ce   : > { %v601_v47 = vpop.xlane.xlu0 %600  ;;  %v1233_v42 = vpop.xlane.xlu1 %1232 }
 0x1cf   : > { %v569_v35 = vrot.slane %v568_v34, 2  ;;  %v602_v43 = vrot.slane %v601_v47, 4  ;;  %v1240_v60 = vmul.f32 %v1237_v30, %v1233_v42 }
 0x1d1   : > { %v603_v45 = vadd.f32 %v602_v43, %v601_v47  ;;  %v570_v46 = vadd.f32 %v569_v35, %v568_v34 }
 0x1d2   : > { %v1227_v49 = vpop.xlane.xlu0 %1226  ;;  %v1236_v48 = vpop.xlane.xlu1 %1235 }
 0x1d3   : > { %v604_v50 = vrot.slane %v603_v45, 2  ;;  %v1238_v39 = vmul.f32 %v1237_v30, %v1227_v49  ;;  %v571_v52 = vrot.slane %v570_v46, 1  ;;  %v1241_v63 = vmul.f32 %v1237_v30, %v1236_v48 }
 0x1d5   : > { %v572_v53 = vadd.f32 %v571_v52, %v570_v46  ;;  %v605_v54 = vadd.f32 %v604_v50, %v603_v45 }
 0x1d6   : > { %v1230_v41 = vpop.xlane.xlu0 %1229  ;;  %v1194_v57 = vpop.xlane.xlu1 %1193 }
 0x1d7   : > { %v1239_v56 = vmul.f32 %v1237_v30, %v1230_v41  ;;  %2259 = vpush %v572_v53  ;;  %v606_v44 = vrot.slane %v605_v54, 1  ;;  %v1242_v59 = vadd.f32 %v1238_v39, %v1194_v57 }
 0x1d9   : > { %v607_v61 = vadd.f32 %v606_v44, %v605_v54  ;;  %v1254_v58 = vmul.f32 %v1246_v55, %v1242_v59 }
 0x1da   : > { %v1204_v62 = vpop.xlane.xlu0 %1203 }
 0x1db   : > { %v1243_v0 = vadd.f32 %v1239_v56, %v1204_v62  ;;  %2261 = vpush %v607_v61  ;;  %1290 = vrot.lane.b32.xlu1 %v1254_v58, %s2356_s30  ;;  %v1258_v29 = vsel %vm522_vm1, %v1254_v58, 0.0  ;;  %v2808_v58 = vand.u32 127, %v1104_v11  ;;  %v1424_v62 = vld [vmem:[%s3091_s10] sm:$0x3] }
 0x1dc   : > { %v1433_v11 = vrot.slane %v1424_v62, %v2615_v15 }
 0x1dd   : > { %v1255_v4 = vmul.f32 %v1247_v51, %v1243_v0  ;;  %vm1415_vm2 = vcmp.lt.s32.totalorder %v2808_v58, 17  ;;  %vm1460_vm3 = vcmp.lt.s32.totalorder %v2808_v58, 16  ;;  %vm1506_vm4 = vcmp.lt.s32.totalorder %v2808_v58, 15 }
 0x1de   : > { %v1224_v17 = vpop.xlane.xlu0 %1223  ;;  %vm1552_vm5 = vcmp.lt.s32.totalorder %v2808_v58, 1  ;;  %vm1619_vm6 = vcmp.lt.s32.totalorder %v2808_v58, 127  ;;  %vm1665_vm7 = vcmp.lt.s32.totalorder %v2808_v58, 113  ;;  %vm1711_vm8 = vcmp.lt.s32.totalorder %v2808_v58, 112 }
 0x1df   : > { %v1245_v28 = vadd.f32 %v1241_v63, %v1224_v17  ;;  %1292 = vrot.lane.b32.xlu0 %v1255_v4, %s2356_s30  ;;  %v1259_v24 = vsel %vm522_vm1, %v1255_v4, 0.0  ;;  %v1429_v4 = vrot.slane %v1424_v62, %v2607_v13  ;;  %vm1757_vm9 = vcmp.lt.s32.totalorder %v2808_v58, 111  ;;  %v2306_v58 = vld [vmem:[%s3089_s8 + $0x20] ss:$12 sps:$4 sm:$0xff]  }
 0x1e0   : > { %v1260_v26 = vadd.f32 %v1259_v24, %v1258_v29 }
 0x1e1   : > { %v1257_v18 = vmul.f32 %v1249_v16, %v1245_v28 }
 0x1e2   : > { %v1214_v19 = vpop.xlane.xlu0 %1213 }
 0x1e3   : > { %v1244_v21 = vadd.f32 %v1240_v60, %v1214_v19  ;;  %1296 = vrot.lane.b32.xlu0 %v1257_v18, %s2356_s30  ;;  %v1263_v36 = vsel %vm522_vm1, %v1257_v18, 0.0 }
 0x1e5   : > { %v1256_v23 = vmul.f32 %v1248_v14, %v1244_v21 }
 0x1e7   : > { %1294 = vrot.lane.b32.xlu1 %v1256_v23, %s2356_s30  ;;  %v1261_v8 = vsel %vm522_vm1, %v1256_v23, 0.0 }
 0x1e8   : > { %v1262_v38 = vadd.f32 %v1261_v8, %v1260_v26 }
 0x1ea   : > { %v1264_v27 = vadd.f32 %v1263_v36, %v1262_v38 }
 0x208   : > { %s2260_s24 = spop %2259 }
 0x209   : > { %v574_v32 = vstv %s2260_s24 }
 0x20a   : > { %v575_v40 = vmul.f32 %v574_v32, %v517_v31 }
 0x20b   : > { %1265 = vadd.xlane.f32.xlu1 %v1264_v27 }
 0x20c   : > { %v2153_v25 = vrot.slane %v575_v40, 9  ;;  %s2262_s25 = spop %2261 }
 0x20d   : > { %v609_v37 = vstv %s2262_s25 }
 0x20e   : > { %v610_v34 = vmul.f32 %v609_v37, %v517_v31  ;;  %v580_v47 = vadd.f32 %v2153_v25, %v540_v22 }
 0x210   : > { %v2154_v42 = vrot.slane %v610_v34, 10 }
 0x212   : > { %v615_v35 = vadd.f32 %v2154_v42, %v580_v47  ;;  %v2182_v47 = vld [vmem:[%s3091_s10 + $0x2] sm:$0x3] }
 0x214   : > { %v2155_v43 = vmul.f32 -1.442695, %v615_v35 }
 0x216   : > { %2307 = vpow2.f32 %v2155_v43 }
 0x220   : > { %v2308_v30 = vpop.eup %2307 }
 0x221   : > { %v619_v45 = vadd.f32 1.0, %v2308_v30 }
 0x223   : > { %2309 = vrcp.f32 %v619_v45 }
 0x22d   : > { %v2310_v46 = vpop.eup %2309 }
 0x22e   : > { %v1374_v49 = vrot.slane %v2310_v46, %v2607_v13  ;;  %v1378_v48 = vrot.slane %v2310_v46, %v1122_v20 }
 0x230   : > { %v1384_v50 = vrot.slane %v1374_v49, %v2607_v13  ;;  %v1388_v39 = vrot.slane %v1378_v48, %v2607_v13  ;;  %v1475_v49 = vrot.slane %v2182_v47, %v2607_v13  ;;  %v1479_v48 = vrot.slane %v2182_v47, %v2615_v15 }
 0x232   : > { %v2702_v52 = vmul.f32 %v1384_v50, %v2469_v1  ;;  %v2705_v53 = vmul.f32 %v1388_v39, %v2471_v2  ;;  %v2710_v54 = vmul.f32 %v1384_v50, %v2479_v6  ;;  %v2713_v12 = vmul.f32 %v1384_v50, %v2486_v9 }
 0x233   : > { %v2718_v1 = vmul.f32 %v1388_v39, %v2481_v7  ;;  %v2721_v2 = vmul.f32 %v1388_v39, %v2488_v10  ;;  %v2726_v6 = vmul.f32 %v1384_v50, %v2473_v3  ;;  %v2731_v9 = vmul.f32 %v1388_v39, %v2477_v5 }
 0x234   : > { %1405 = vrot.lane.b32.xlu0 %v2705_v53, %s2358_s26  ;;  %1397 = vrot.lane.b32.xlu1 %v2702_v52, %s2358_s26 }
 0x238   : > { %1403 = vrot.lane.b32.xlu0 %v2713_v12, %s2358_s26  ;;  %1399 = vrot.lane.b32.xlu1 %v2710_v54, %s2358_s26 }
 0x23c   : > { %1411 = vrot.lane.b32.xlu0 %v2721_v2, %s2358_s26  ;;  %1407 = vrot.lane.b32.xlu1 %v2718_v1, %s2358_s26 }
 0x240   : > { %1446 = vrot.lane.b32.xlu0 %v2710_v54, %s2359_s27  ;;  %1401 = vrot.lane.b32.xlu1 %v2726_v6, %s2358_s26 }
 0x244   : > { %1454 = vrot.lane.b32.xlu0 %v2718_v1, %s2359_s27  ;;  %1409 = vrot.lane.b32.xlu1 %v2731_v9, %s2358_s26 }
 0x248   : > { %1450 = vrot.lane.b32.xlu0 %v2713_v12, %s2359_s27  ;;  %1444 = vrot.lane.b32.xlu1 %v2702_v52, %s2359_s27 }
 0x24c   : > { %1458 = vrot.lane.b32.xlu0 %v2721_v2, %s2359_s27  ;;  %1452 = vrot.lane.b32.xlu1 %v2705_v53, %s2359_s27 }
 0x24d   : > { %v2779_v3 = vpop.permute.xlu1 %1290 }
 0x24e   : > { %v1302_v42 = vsel %vm522_vm1, %v2779_v3, 0.0 }
 0x250   : > { %1492 = vrot.lane.b32.xlu0 %v2710_v54, %s2360_s28  ;;  %1448 = vrot.lane.b32.xlu1 %v2726_v6, %s2359_s27 }
 0x251   : > { %v1293_v41 = vpop.permute.xlu0 %1292 }
 0x252   : > { %v1303_v35 = vsel %vm522_vm1, %v1293_v41, 0.0 }
 0x253   : > { %v1304_v50 = vadd.f32 %v1303_v35, %v1302_v42 }
 0x254   : > { %1500 = vrot.lane.b32.xlu0 %v2718_v1, %s2360_s28  ;;  %1456 = vrot.lane.b32.xlu1 %v2731_v9, %s2359_s27 }
 0x255   : > { %v2801_v44 = vpop.permute.xlu0 %1296 }
 0x256   : > { %v1307_v62 = vsel %vm522_vm1, %v2801_v44, 0.0 }
 0x258   : > { %1496 = vrot.lane.b32.xlu0 %v2713_v12, %s2360_s28  ;;  %1490 = vrot.lane.b32.xlu1 %v2702_v52, %s2360_s28 }
 0x259   : > { %v2784_v5 = vpop.permute.xlu1 %1294 }
 0x25a   : > { %v1305_v3 = vsel %vm522_vm1, %v2784_v5, 0.0 }
 0x25c   : > { %1504 = vrot.lane.b32.xlu0 %v2721_v2, %s2360_s28  ;;  %1498 = vrot.lane.b32.xlu1 %v2705_v53, %s2360_s28 }
 0x260   : > { %1538 = vrot.lane.b32.xlu0 %v2710_v54, %s2361_s13  ;;  %1494 = vrot.lane.b32.xlu1 %v2726_v6, %s2360_s28 }
 0x264   : > { %1546 = vrot.lane.b32.xlu0 %v2718_v1, %s2361_s13  ;;  %1502 = vrot.lane.b32.xlu1 %v2731_v9, %s2360_s28 }
 0x268   : > { %1542 = vrot.lane.b32.xlu0 %v2713_v12, %s2361_s13  ;;  %1536 = vrot.lane.b32.xlu1 %v2702_v52, %s2361_s13 }
 0x26c   : > { %1550 = vrot.lane.b32.xlu0 %v2721_v2, %s2361_s13  ;;  %1544 = vrot.lane.b32.xlu1 %v2705_v53, %s2361_s13 }
 0x270   : > { %1605 = vrot.lane.b32.xlu0 %v2710_v54, %s2356_s30  ;;  %1540 = vrot.lane.b32.xlu1 %v2726_v6, %s2361_s13 }
 0x274   : > { %1613 = vrot.lane.b32.xlu0 %v2718_v1, %s2356_s30  ;;  %1548 = vrot.lane.b32.xlu1 %v2731_v9, %s2361_s13  ;;  %s487_s13 = scalar_lea.vmem %s3093_s12, %s2200_s29 }
 0x278   : > { %1609 = vrot.lane.b32.xlu0 %v2713_v12, %s2356_s30  ;;  %1603 = vrot.lane.b32.xlu1 %v2702_v52, %s2356_s30 }
 0x27c   : > { %1617 = vrot.lane.b32.xlu0 %v2721_v2, %s2356_s30  ;;  %1611 = vrot.lane.b32.xlu1 %v2705_v53, %s2356_s30 }
 0x280   : > { %1651 = vrot.lane.b32.xlu0 %v2710_v54, %s2362_s14  ;;  %1607 = vrot.lane.b32.xlu1 %v2726_v6, %s2356_s30 }
 0x284   : > { %1659 = vrot.lane.b32.xlu0 %v2718_v1, %s2362_s14  ;;  %1615 = vrot.lane.b32.xlu1 %v2731_v9, %s2356_s30 }
 0x288   : > { %1655 = vrot.lane.b32.xlu0 %v2713_v12, %s2362_s14  ;;  %1649 = vrot.lane.b32.xlu1 %v2702_v52, %s2362_s14 }
 0x28c   : > { %1663 = vrot.lane.b32.xlu0 %v2721_v2, %s2362_s14  ;;  %1657 = vrot.lane.b32.xlu1 %v2705_v53, %s2362_s14 }
 0x290   : > { %1697 = vrot.lane.b32.xlu0 %v2710_v54, %s2363_s15  ;;  %1653 = vrot.lane.b32.xlu1 %v2726_v6, %s2362_s14 }
 0x294   : > { %1705 = vrot.lane.b32.xlu0 %v2718_v1, %s2363_s15  ;;  %1661 = vrot.lane.b32.xlu1 %v2731_v9, %s2362_s14 }
 0x298   : > { %1743 = vrot.lane.b32.xlu0 %v2710_v54, %s2364_s16  ;;  %1695 = vrot.lane.b32.xlu1 %v2702_v52, %s2363_s15  ;;  %v1266_v7 = vpop.xlane.xlu1 %1265 }
 0x299   : > { %v1267_v10 = vrot.slane %v1266_v7, 4 }
 0x29b   : > { %v1268_v20 = vadd.f32 %v1267_v10, %v1266_v7 }
 0x29c   : > { %1751 = vrot.lane.b32.xlu0 %v2718_v1, %s2364_s16  ;;  %1703 = vrot.lane.b32.xlu1 %v2705_v53, %s2363_s15 }
 0x29d   : > { %v1269_v55 = vrot.slane %v1268_v20, 2 }
 0x29f   : > { %v1270_v57 = vadd.f32 %v1269_v55, %v1268_v20 }
 0x2a0   : > { %1701 = vrot.lane.b32.xlu0 %v2713_v12, %s2363_s15  ;;  %1741 = vrot.lane.b32.xlu1 %v2702_v52, %s2364_s16 }
 0x2a1   : > { %v1271_v56 = vrot.slane %v1270_v57, 1 }
 0x2a3   : > { %v1272_v59 = vadd.f32 %v1271_v56, %v1270_v57 }
 0x2a4   : > { %1709 = vrot.lane.b32.xlu0 %v2721_v2, %s2363_s15  ;;  %1749 = vrot.lane.b32.xlu1 %v2705_v53, %s2364_s16 }
 0x2a5   : > { %2263 = vpush %v1272_v59 }
 0x2a6   : > { %v1398_v61 = vpop.permute.xlu1 %1397  ;;  %v1406_v51 = vpop.permute.xlu0 %1405 }
 0x2a7   : > { %v1416_v16 = vsel %vm1415_vm2, %v1398_v61, %v1406_v51  ;;  %v1420_v17 = vsel %vm1415_vm2, %v1406_v51, %v1398_v61  ;;  %v1306_v51 = vadd.f32 %v1305_v3, %v1304_v50 }
 0x2a8   : > { %1745 = vrot.lane.b32.xlu0 %v2726_v6, %s2364_s16  ;;  %1699 = vrot.lane.b32.xlu1 %v2726_v6, %s2363_s15  ;;  %v1436_v19 = vmul.f32 %v1429_v4, %v1420_v17  ;;  %v1437_v21 = vmul.f32 %v1433_v11, %v1416_v16 }
 0x2a9   : > { %v1308_v17 = vadd.f32 %v1307_v62, %v1306_v51 }
 0x2aa   : > { %v1400_v63 = vpop.permute.xlu1 %1399  ;;  %v1404_v0 = vpop.permute.xlu0 %1403 }
 0x2ac   : > { %1707 = vrot.lane.b32.xlu1 %v2731_v9, %s2363_s15 }
 0x2ae   : > { %v1408_v60 = vpop.permute.xlu1 %1407  ;;  %v1412_v28 = vpop.permute.xlu0 %1411 }
 0x2af   : > { %v1417_v18 = vsel %vm1415_vm2, %v1400_v63, %v1408_v60  ;;  %v1421_v14 = vsel %vm1415_vm2, %v1408_v60, %v1400_v63  ;;  %v1419_v36 = vsel %vm1415_vm2, %v1404_v0, %v1412_v28  ;;  %v1423_v27 = vsel %vm1415_vm2, %v1412_v28, %v1404_v0 }
 0x2b0   : > { %v1438_v23 = vmul.f32 %v1429_v4, %v1421_v14  ;;  %v1439_v24 = vmul.f32 %v1433_v11, %v1417_v18  ;;  %1747 = vrot.lane.b32.xlu1 %v2713_v12, %s2364_s16  ;;  %v1442_v25 = vmul.f32 %v1429_v4, %v1423_v27  ;;  %v1443_v37 = vmul.f32 %v1433_v11, %v1419_v36 }
 0x2b2   : > { %v1787_v29 = vpack.c.bf16 %v1438_v23, %v1436_v19  ;;  %v1402_v26 = vpop.permute.xlu1 %1401  ;;  %v1447_v8 = vpop.permute.xlu0 %1446  ;;  %v1788_v38 = vpack.c.bf16 %v1439_v24, %v1437_v21  ;;  %v2183_v24 = vld [vmem:[%s3091_s10 + $0x4] sm:$0x3] }
 0x2b3   : > { %v1521_v36 = vrot.slane %v2183_v24, %v2607_v13  ;;  %v1525_v27 = vrot.slane %v2183_v24, %v2615_v15 }
 0x2b4   : > { %1753 = vrot.lane.b32.xlu1 %v2731_v9, %s2364_s16  ;;  %1892 = vmatprep.subr.bf16.mxu1 %v1788_v38 }
 0x2b5   : > { %1893 = vmatpush1.bf16.msra.mxu1 %v1787_v29 }
 0x2b6   : > { %v1410_v31 = vpop.permute.xlu1 %1409  ;;  %v1455_v32 = vpop.permute.xlu0 %1454 }
 0x2b7   : > { %v1418_v40 = vsel %vm1415_vm2, %v1402_v26, %v1410_v31  ;;  %v1422_v33 = vsel %vm1415_vm2, %v1410_v31, %v1402_v26  ;;  %v1462_v39 = vsel %vm1460_vm3, %v1447_v8, %v1455_v32  ;;  %v1466_v7 = vsel %vm1460_vm3, %v1455_v32, %v1447_v8 }
 0x2b8   : > { %v1440_v22 = vmul.f32 %v1429_v4, %v1422_v33  ;;  %v1441_v34 = vmul.f32 %v1433_v11, %v1418_v40  ;;  %v1484_v57 = vmul.f32 %v1475_v49, %v1466_v7  ;;  %v1485_v56 = vmul.f32 %v1479_v48, %v1462_v39 }
 0x2ba   : > { %v1789_v43 = vpack.c.bf16 %v1442_v25, %v1440_v22  ;;  %v1445_v30 = vpop.permute.xlu1 %1444  ;;  %v1451_v45 = vpop.permute.xlu0 %1450  ;;  %v1790_v46 = vpack.c.bf16 %v1443_v37, %v1441_v34 }
 0x2bc   : > { %1894 = vmatprep.subr.bf16.mxu1 %v1790_v46 }
 0x2bd   : > { %1895 = vmatpush1.bf16.msra.mxu1 %v1789_v43 }
 0x2be   : > { %v1453_v10 = vpop.permute.xlu1 %1452  ;;  %v1459_v20 = vpop.permute.xlu0 %1458 }
 0x2bf   : > { %v1461_v41 = vsel %vm1460_vm3, %v1445_v30, %v1453_v10  ;;  %v1465_v55 = vsel %vm1460_vm3, %v1453_v10, %v1445_v30  ;;  %v1464_v11 = vsel %vm1460_vm3, %v1451_v45, %v1459_v20  ;;  %v1468_v16 = vsel %vm1460_vm3, %v1459_v20, %v1451_v45 }
 0x2c0   : > { %v1482_v59 = vmul.f32 %v1475_v49, %v1465_v55  ;;  %v1483_v61 = vmul.f32 %v1479_v48, %v1461_v41  ;;  %v1488_v14 = vmul.f32 %v1475_v49, %v1468_v16  ;;  %v1489_v19 = vmul.f32 %v1479_v48, %v1464_v11  ;;  %v2184_v55 = vld [vmem:[%s3091_s10 + $0x6] sm:$0x3] }
 0x2c1   : > { %v1567_v51 = vrot.slane %v2184_v55, %v2607_v13  ;;  %v1571_v62 = vrot.slane %v2184_v55, %v2615_v15 }
 0x2c2   : > { %v1791_v63 = vpack.c.bf16 %v1484_v57, %v1482_v59  ;;  %v1449_v0 = vpop.permute.xlu1 %1448  ;;  %v1493_v4 = vpop.permute.xlu0 %1492  ;;  %v1792_v5 = vpack.c.bf16 %v1485_v56, %v1483_v61 }
 0x2c4   : > { %1896 = vmatprep.subr.bf16.mxu1 %v1792_v5 }
 0x2c5   : > { %1897 = vmatpush1.bf16.msra.mxu1 %v1791_v63 }
 0x2c6   : > { %v1457_v60 = vpop.permute.xlu1 %1456  ;;  %v1501_v28 = vpop.permute.xlu0 %1500 }
 0x2c7   : > { %v1463_v18 = vsel %vm1460_vm3, %v1449_v0, %v1457_v60  ;;  %v1467_v44 = vsel %vm1460_vm3, %v1457_v60, %v1449_v0  ;;  %1309 = vadd.xlane.f32.xlu0 %v1308_v17  ;;  %v1508_v31 = vsel %vm1506_vm4, %v1493_v4, %v1501_v28  ;;  %v1512_v32 = vsel %vm1506_vm4, %v1501_v28, %v1493_v4 }
 0x2c8   : > { %v1486_v21 = vmul.f32 %v1475_v49, %v1467_v44  ;;  %v1487_v23 = vmul.f32 %v1479_v48, %v1463_v18  ;;  %v1530_v22 = vmul.f32 %v1521_v36, %v1512_v32  ;;  %v1531_v34 = vmul.f32 %v1525_v27, %v1508_v31  ;;  %v2185_v44 = vld [vmem:[%s3091_s10 + $0x8] sm:$0x3] }
 0x2c9   : > { %v1592_v24 = vrot.slane %v2185_v44, %v2615_v15 }
 0x2ca   : > { %v1793_v29 = vpack.c.bf16 %v1488_v14, %v1486_v21  ;;  %v1491_v26 = vpop.permute.xlu1 %1490  ;;  %v1497_v8 = vpop.permute.xlu0 %1496  ;;  %v1794_v38 = vpack.c.bf16 %v1489_v19, %v1487_v23 }
 0x2cb   : > { %v1596_v32 = vmul.f32 %v1592_v24, %v2705_v53 }
 0x2cc   : > { %1898 = vmatprep.subr.bf16.mxu1 %v1794_v38 }
 0x2cd   : > { %1899 = vmatpush1.bf16.msra.mxu1 %v1793_v29 }
 0x2ce   : > { %v1499_v40 = vpop.permute.xlu1 %1498  ;;  %v1505_v33 = vpop.permute.xlu0 %1504 }
 0x2cf   : > { %v1507_v25 = vsel %vm1506_vm4, %v1491_v26, %v1499_v40  ;;  %v1511_v37 = vsel %vm1506_vm4, %v1499_v40, %v1491_v26  ;;  %v1510_v46 = vsel %vm1506_vm4, %v1497_v8, %v1505_v33  ;;  %v1514_v49 = vsel %vm1506_vm4, %v1505_v33, %v1497_v8 }
 0x2d0   : > { %v1528_v47 = vmul.f32 %v1521_v36, %v1511_v37  ;;  %v1529_v42 = vmul.f32 %v1525_v27, %v1507_v25  ;;  %v1534_v3 = vmul.f32 %v1521_v36, %v1514_v49  ;;  %v1535_v10 = vmul.f32 %v1525_v27, %v1510_v46 }
 0x2d1   : > { %v1598_v40 = vmul.f32 %v1592_v24, %v2718_v1  ;;  %v1600_v1 = vmul.f32 %v1592_v24, %v2731_v9  ;;  %v1602_v46 = vmul.f32 %v1592_v24, %v2721_v2 }
 0x2d2   : > { %v1795_v35 = vpack.c.bf16 %v1530_v22, %v1528_v47  ;;  %v1495_v43 = vpop.permute.xlu1 %1494  ;;  %v1539_v30 = vpop.permute.xlu0 %1538  ;;  %v1796_v45 = vpack.c.bf16 %v1531_v34, %v1529_v42 }
 0x2d3   : > { %v1804_v53 = vpack.c.bf16 %v1598_v40, %v1596_v32 }
 0x2d4   : > { %1900 = vmatprep.subr.bf16.mxu1 %v1796_v45 }
 0x2d5   : > { %1901 = vmatpush1.bf16.msra.mxu1 %v1795_v35 }
 0x2d6   : > { %v1503_v48 = vpop.permute.xlu1 %1502  ;;  %v1547_v50 = vpop.permute.xlu0 %1546  ;;  %s3038_s20 = spop %2263 }
 0x2d7   : > { %v1509_v39 = vsel %vm1506_vm4, %v1495_v43, %v1503_v48  ;;  %v1513_v7 = vsel %vm1506_vm4, %v1503_v48, %v1495_v43  ;;  %v1554_v63 = vsel %vm1552_vm5, %v1539_v30, %v1547_v50  ;;  %v1558_v0 = vsel %vm1552_vm5, %v1547_v50, %v1539_v30  ;;  %v2186_v43 = vld [vmem:[%s3091_s10 + $0xa] sm:$0x3]  ;;  %p1274_p2 = scmp.ge.f32.partialorder %s3038_s20, 0.0 }
 0x2d8   : > { %v1532_v20 = vmul.f32 %v1521_v36, %v1513_v7  ;;  %v1533_v41 = vmul.f32 %v1525_v27, %v1509_v39  ;;  %v1576_v17 = vmul.f32 %v1567_v51, %v1558_v0  ;;  %v1577_v60 = vmul.f32 %v1571_v62, %v1554_v63 }
 0x2d9   : > { %v1588_v36 = vrot.slane %v2185_v44, %v2607_v13  ;;  %v1638_v49 = vrot.slane %v2186_v43, %v2615_v15 }
 0x2da   : > { %v1797_v57 = vpack.c.bf16 %v1534_v3, %v1532_v20  ;;  %v1537_v56 = vpop.permute.xlu1 %1536  ;;  %v1543_v59 = vpop.permute.xlu0 %1542  ;;  %v1798_v61 = vpack.c.bf16 %v1535_v10, %v1533_v41  ;;  %v1806_v10 = vpack.c.bf16 %v1602_v46, %v1600_v1  ;;  %v1634_v20 = vrot.slane %v2186_v43, %v2607_v13 }
 0x2db   : > { %v1595_v30 = vmul.f32 %v1588_v36, %v2702_v52  ;;  %v1597_v45 = vmul.f32 %v1588_v36, %v2710_v54  ;;  %v1599_v39 = vmul.f32 %v1588_v36, %v2726_v6  ;;  %v1601_v3 = vmul.f32 %v1588_v36, %v2713_v12 }
 0x2dc   : > { %1902 = vmatprep.subr.bf16.mxu1 %v1798_v61 }
 0x2dd   : > { %1755 = vrot.lane.b32.xlu0 %v2721_v2, %s2364_s16  ;;  %1903 = vmatpush1.bf16.msra.mxu1 %v1797_v57  ;;  %v1803_v7 = vpack.c.bf16 %v1597_v45, %v1595_v30 }
 0x2de   : > { %v1545_v4 = vpop.permute.xlu1 %1544  ;;  %v1551_v5 = vpop.permute.xlu0 %1550 }
 0x2df   : > { %v1553_v11 = vsel %vm1552_vm5, %v1537_v56, %v1545_v4  ;;  %v1557_v16 = vsel %vm1552_vm5, %v1545_v4, %v1537_v56  ;;  %v1556_v29 = vsel %vm1552_vm5, %v1543_v59, %v1551_v5  ;;  %v1560_v26 = vsel %vm1552_vm5, %v1551_v5, %v1543_v59 }
 0x2e0   : > { %v1574_v28 = vmul.f32 %v1567_v51, %v1557_v16  ;;  %v1575_v18 = vmul.f32 %v1571_v62, %v1553_v11  ;;  %v1580_v33 = vmul.f32 %v1567_v51, %v1560_v26  ;;  %v1581_v25 = vmul.f32 %v1571_v62, %v1556_v29 }
 0x2e1   : > { %v1805_v59 = vpack.c.bf16 %v1601_v3, %v1599_v39 }
 0x2e2   : > { %v1799_v14 = vpack.c.bf16 %v1576_v17, %v1574_v28  ;;  %v1541_v19 = vpop.permute.xlu1 %1540  ;;  %v1606_v21 = vpop.permute.xlu0 %1605  ;;  %v1800_v23 = vpack.c.bf16 %v1577_v60, %v1575_v18  ;;  %v2187_v18 = vld [vmem:[%s3091_s10 + $0xc] sm:$0x3] }
 0x2e3   : > { %v1684_v24 = vrot.slane %v2187_v18, %v2615_v15 }
 0x2e4   : > { %1904 = vmatprep.subr.bf16.mxu1 %v1800_v23  ;;  %v1680_v23 = vrot.slane %v2187_v18, %v2607_v13 }
 0x2e5   : > { %1905 = vmatpush1.bf16.msra.mxu1 %v1799_v14 }
 0x2e6   : > { %v1549_v8 = vpop.permute.xlu1 %1548  ;;  %v1614_v38 = vpop.permute.xlu0 %1613 }
 0x2e7   : > { %v1555_v27 = vsel %vm1552_vm5, %v1541_v19, %v1549_v8  ;;  %v1559_v31 = vsel %vm1552_vm5, %v1549_v8, %v1541_v19  ;;  %v1625_v52 = vsel %vm1619_vm6, %v1614_v38, %v1606_v21  ;;  %v1621_v6 = vsel %vm1619_vm6, %v1606_v21, %v1614_v38 }
 0x2e8   : > { %v1578_v37 = vmul.f32 %v1567_v51, %v1559_v31  ;;  %v1579_v22 = vmul.f32 %v1571_v62, %v1555_v27  ;;  %v1644_v41 = vmul.f32 %v1638_v49, %v1625_v52  ;;  %v1643_v51 = vmul.f32 %v1634_v20, %v1621_v6 }
 0x2ea   : > { %v1801_v34 = vpack.c.bf16 %v1580_v33, %v1578_v37  ;;  %v1604_v47 = vpop.permute.xlu1 %1603  ;;  %v1610_v42 = vpop.permute.xlu0 %1609  ;;  %v1802_v35 = vpack.c.bf16 %v1581_v25, %v1579_v22 }
 0x2ec   : > { %1906 = vmatprep.subr.bf16.mxu1 %v1802_v35 }
 0x2ed   : > { %1907 = vmatpush1.bf16.msra.mxu1 %v1801_v34 }
 0x2ee   : > { %v1612_v48 = vpop.permute.xlu1 %1611  ;;  %1908 = vmatprep.subr.bf16.mxu1 %v1804_v53  ;;  %v1618_v50 = vpop.permute.xlu0 %1617 }
 0x2ef   : > { %v1624_v54 = vsel %vm1619_vm6, %v1612_v48, %v1604_v47  ;;  %v1620_v2 = vsel %vm1619_vm6, %v1604_v47, %v1612_v48  ;;  %v1623_v12 = vsel %vm1619_vm6, %v1610_v42, %v1618_v50  ;;  %v1627_v62 = vsel %vm1619_vm6, %v1618_v50, %v1610_v42  ;;  %v2188_v48 = vld [vmem:[%s3091_s10 + $0xe] sm:$0x3] }
 0x2f0   : > { %v1642_v9 = vmul.f32 %v1638_v49, %v1624_v54  ;;  %v1641_v56 = vmul.f32 %v1634_v20, %v1620_v2  ;;  %v1647_v16 = vmul.f32 %v1634_v20, %v1623_v12  ;;  %v1648_v17 = vmul.f32 %v1638_v49, %v1627_v62 }
 0x2f1   : > { %1909 = vmatpush1.bf16.msra.mxu1 %v1803_v7  ;;  %v1726_v7 = vrot.slane %v2188_v48, %v2607_v13  ;;  %v1730_v3 = vrot.slane %v2188_v48, %v2615_v15 }
 0x2f2   : > { %v1608_v55 = vpop.permute.xlu1 %1607  ;;  %1910 = vmatprep.subr.bf16.mxu1 %v1806_v10  ;;  %v1652_v57 = vpop.permute.xlu0 %1651  ;;  %v1808_v61 = vpack.c.bf16 %v1644_v41, %v1642_v9  ;;  %v1807_v4 = vpack.c.bf16 %v1643_v51, %v1641_v56 }
 0x2f5   : > { %1911 = vmatpush1.bf16.msra.mxu1 %v1805_v59 }
 0x2f6   : > { %v1616_v63 = vpop.permute.xlu1 %1615  ;;  %1912 = vmatprep.subr.bf16.mxu1 %v1808_v61  ;;  %v1660_v0 = vpop.permute.xlu0 %1659  ;;  %v2189_v61 = vld [vmem:[%s3091_s10 + $0x10] sm:$0x3] }
 0x2f7   : > { %v1622_v5 = vsel %vm1619_vm6, %v1608_v55, %v1616_v63  ;;  %v1626_v11 = vsel %vm1619_vm6, %v1616_v63, %v1608_v55  ;;  %v1667_v29 = vsel %vm1665_vm7, %v1652_v57, %v1660_v0  ;;  %v1671_v26 = vsel %vm1665_vm7, %v1660_v0, %v1652_v57 }
 0x2f8   : > { %v1645_v60 = vmul.f32 %v1634_v20, %v1622_v5  ;;  %v1646_v28 = vmul.f32 %v1638_v49, %v1626_v11  ;;  %v1689_v31 = vmul.f32 %v1680_v23, %v1667_v29  ;;  %v1690_v32 = vmul.f32 %v1684_v24, %v1671_v26  ;;  %v2301_v26 = vld [vmem:[%s3089_s8 + $0x4] ss:$12 sps:$4 sm:$0xff]  }
 0x2f9   : > { %1913 = vmatpush1.bf16.msra.mxu1 %v1807_v4  ;;  %v1772_v0 = vrot.slane %v2189_v61, %v2607_v13  ;;  %v1776_v4 = vrot.slane %v2189_v61, %v2615_v15  ;;  %1924 = vmatprep.mubr.bf16.mxu1 %v2301_v26  ;;  %v1253_v61 = vld [vmem:[%s3088_s7 + $0x18] sm:$0xff] }
 0x2fa   : > { %v1809_v44 = vpack.c.bf16 %v1647_v16, %v1645_v60  ;;  %v1650_v14 = vpop.permute.xlu1 %1649  ;;  %v1656_v19 = vpop.permute.xlu0 %1655  ;;  %v1810_v21 = vpack.c.bf16 %v1648_v17, %v1646_v28 }
 0x2fc   : > { %1914 = vmatprep.subr.bf16.mxu1 %v1810_v21 }
 0x2fd   : > { %1915 = vmatpush1.bf16.msra.mxu1 %v1809_v44 }
 0x2fe   : > { %v1658_v8 = vpop.permute.xlu1 %1657  ;;  %v1664_v38 = vpop.permute.xlu0 %1663 }
 0x2ff   : > { %v1666_v36 = vsel %vm1665_vm7, %v1650_v14, %v1658_v8  ;;  %v1670_v27 = vsel %vm1665_vm7, %v1658_v8, %v1650_v14  ;;  %v1669_v47 = vsel %vm1665_vm7, %v1656_v19, %v1664_v38  ;;  %v1673_v42 = vsel %vm1665_vm7, %v1664_v38, %v1656_v19 }
 0x300   : > { %v1687_v40 = vmul.f32 %v1680_v23, %v1666_v36  ;;  %v1688_v33 = vmul.f32 %v1684_v24, %v1670_v27  ;;  %v1693_v53 = vmul.f32 %v1680_v23, %v1669_v47  ;;  %v1694_v1 = vmul.f32 %v1684_v24, %v1673_v42 }
 0x301   : > { %v2365_v27 = vmov 0  }
 0x302   : > { %v1811_v25 = vpack.c.bf16 %v1689_v31, %v1687_v40  ;;  %v1654_v37 = vpop.permute.xlu1 %1653  ;;  %v1698_v22 = vpop.permute.xlu0 %1697  ;;  %v1812_v34 = vpack.c.bf16 %v1690_v32, %v1688_v33  ;;  %1977 = vmatprep.mubr.bf16.mxu0 %v2365_v27  ;;  %2297 = vset.pattern.permute.xlu1 %v2365_v27 }
 0x303   : > { %2298 = vset.pattern.permute.xlu0 %v2365_v27 }
 0x304   : > { %1916 = vmatprep.subr.bf16.mxu1 %v1812_v34  ;;  %v2305_v34 = vld [vmem:[%s3089_s8 + $0x18] ss:$12 sps:$4 sm:$0xff]  }
 0x305   : > { %1917 = vmatpush1.bf16.msra.mxu1 %v1811_v25 }
 0x306   : > { %v1662_v35 = vpop.permute.xlu1 %1661  ;;  %v1706_v43 = vpop.permute.xlu0 %1705 }
 0x307   : > { %v1668_v30 = vsel %vm1665_vm7, %v1654_v37, %v1662_v35  ;;  %v1672_v45 = vsel %vm1665_vm7, %v1662_v35, %v1654_v37  ;;  %v1713_v2 = vsel %vm1711_vm8, %v1698_v22, %v1706_v43  ;;  %v1717_v9 = vsel %vm1711_vm8, %v1706_v43, %v1698_v22  ;;  %v2299_v37 = vld [vmem:[%s3089_s8] ss:$12 sps:$4 sm:$0xff]   ;;  %v2303_v22 = vld [vmem:[%s3089_s8 + $0x1c] ss:$12 sps:$4 sm:$0xff]  }
 0x308   : > { %v1691_v46 = vmul.f32 %v1680_v23, %v1668_v30  ;;  %v1692_v49 = vmul.f32 %v1684_v24, %v1672_v45  ;;  %v1735_v55 = vmul.f32 %v1726_v7, %v1713_v2  ;;  %v1736_v57 = vmul.f32 %v1730_v3, %v1717_v9 }
 0x30a   : > { %v1813_v50 = vpack.c.bf16 %v1693_v53, %v1691_v46  ;;  %v1696_v39 = vpop.permute.xlu1 %1695  ;;  %v1744_v52 = vpop.permute.xlu0 %1743  ;;  %v1814_v54 = vpack.c.bf16 %v1694_v1, %v1692_v49 }
 0x30c   : > { %1918 = vmatprep.subr.bf16.mxu1 %v1814_v54 }
 0x30d   : > { %1919 = vmatpush1.bf16.msra.mxu1 %v1813_v50 }
 0x30e   : > { %v1704_v10 = vpop.permute.xlu1 %1703  ;;  %v1752_v20 = vpop.permute.xlu0 %1751 }
 0x30f   : > { %v1712_v6 = vsel %vm1711_vm8, %v1696_v39, %v1704_v10  ;;  %v1716_v41 = vsel %vm1711_vm8, %v1704_v10, %v1696_v39  ;;  %v1759_v5 = vsel %vm1757_vm9, %v1744_v52, %v1752_v20  ;;  %v1763_v11 = vsel %vm1757_vm9, %v1752_v20, %v1744_v52  ;;  %v2302_v20 = vld [vmem:[%s3089_s8 + $0x8] ss:$12 sps:$4 sm:$0xff]  }
 0x310   : > { %v1733_v56 = vmul.f32 %v1726_v7, %v1712_v6  ;;  %v1734_v59 = vmul.f32 %v1730_v3, %v1716_v41  ;;  %v1781_v28 = vmul.f32 %v1772_v0, %v1759_v5  ;;  %v1782_v18 = vmul.f32 %v1776_v4, %v1763_v11  ;;  %v1834_v5 = vld [vmem:[%s3090_s9 + $0x18] sm:$0xff] }
 0x312   : > { %v1815_v51 = vpack.c.bf16 %v1735_v55, %v1733_v56  ;;  %v1742_v12 = vpop.permute.xlu1 %1741  ;;  %v1816_v62 = vpack.c.bf16 %v1736_v57, %v1734_v59  ;;  %v1702_v63 = vpop.permute.xlu0 %1701  ;;  %v1251_v55 = vld [vmem:[%s3088_s7 + $0x8] sm:$0xff]  ;;  %v1250_v57 = vld [vmem:[%s3088_s7] sm:$0xff] }
 0x314   : > { %1920 = vmatprep.subr.bf16.mxu1 %v1816_v62 }
 0x315   : > { %1921 = vmatpush1.bf16.msra.mxu1 %v1815_v51  ;;  %v1252_v51 = vld [vmem:[%s3088_s7 + $0x10] sm:$0xff] }
 0x316   : > { %v1750_v16 = vpop.permute.xlu1 %1749  ;;  %v1710_v15 = vpop.permute.xlu0 %1709 }
 0x317   : > { %v1758_v17 = vsel %vm1757_vm9, %v1742_v12, %v1750_v16  ;;  %v1762_v60 = vsel %vm1757_vm9, %v1750_v16, %v1742_v12  ;;  %v1715_v23 = vsel %vm1711_vm8, %v1702_v63, %v1710_v15  ;;  %v1719_v24 = vsel %vm1711_vm8, %v1710_v15, %v1702_v63  ;;  %v1831_v63 = vld [vmem:[%s3090_s9] sm:$0xff] }
 0x318   : > { %v1779_v13 = vmul.f32 %v1772_v0, %v1758_v17  ;;  %v1780_v44 = vmul.f32 %v1776_v4, %v1762_v60  ;;  %v1739_v8 = vmul.f32 %v1726_v7, %v1715_v23  ;;  %v1740_v31 = vmul.f32 %v1730_v3, %v1719_v24 }
 0x31a   : > { %v1819_v14 = vpack.c.bf16 %v1781_v28, %v1779_v13  ;;  %v1700_v19 = vpop.permute.xlu1 %1699  ;;  %v1820_v21 = vpack.c.bf16 %v1782_v18, %v1780_v44  ;;  %v1746_v42 = vpop.permute.xlu0 %1745 }
 0x31c   : > { %1945 = vmatprep.subr.bf16.mxu0 %v1820_v21 }
 0x31d   : > { %1946 = vmatpush1.bf16.msra.mxu0 %v1819_v14 }
 0x31e   : > { %v1708_v29 = vpop.permute.xlu1 %1707 }
 0x31f   : > { %v1714_v38 = vsel %vm1711_vm8, %v1700_v19, %v1708_v29  ;;  %v1718_v36 = vsel %vm1711_vm8, %v1708_v29, %v1700_v19 }
 0x320   : > { %v1737_v32 = vmul.f32 %v1726_v7, %v1714_v38  ;;  %v1738_v40 = vmul.f32 %v1730_v3, %v1718_v36 }
 0x322   : > { %v1817_v33 = vpack.c.bf16 %v1739_v8, %v1737_v32  ;;  %v1818_v25 = vpack.c.bf16 %v1740_v31, %v1738_v40  ;;  %v1748_v47 = vpop.permute.xlu1 %1747 }
 0x324   : > { %1922 = vmatprep.subr.bf16.mxu1 %v1818_v25 }
 0x325   : > { %1923 = vmatpush1.bf16.msra.mxu1 %v1817_v33 }
 0x326   : > { %v1754_v35 = vpop.permute.xlu1 %1753 }
 0x327   : > { %v1760_v45 = vsel %vm1757_vm9, %v1746_v42, %v1754_v35  ;;  %v1764_v53 = vsel %vm1757_vm9, %v1754_v35, %v1746_v42 }
 0x328   : > { %1925 = vmatmul.mubr.bf16.vlgmr.msra.gmra.mrb[8].mxu1 %v2299_v37  ;;  %v1783_v39 = vmul.f32 %v1772_v0, %v1760_v45  ;;  %v1784_v52 = vmul.f32 %v1776_v4, %v1764_v53 }
 0x329   : > { %1934 = vmatprep.mubr.bf16.mxu1 %v2303_v22 }
 0x330   : > { %1935 = vmatmul.mubr.bf16.gmra.mrb[12].mxu1 %v2305_v34 }
 0x354   : > { %v1310_v43 = vpop.xlane.xlu0 %1309 }
 0x355   : > { %v1311_v30 = vrot.slane %v1310_v43, 4 }
 0x357   : > { %v1312_v1 = vadd.f32 %v1311_v30, %v1310_v43 }
 0x358   : > { %v1756_v46 = vpop.permute.xlu0 %1755 }
 0x359   : > { %v1313_v49 = vrot.slane %v1312_v1, 2  ;;  %v1761_v48 = vsel %vm1757_vm9, %v1748_v47, %v1756_v46  ;;  %v1765_v50 = vsel %vm1757_vm9, %v1756_v46, %v1748_v47 }
 0x35a   : > { %v1785_v54 = vmul.f32 %v1772_v0, %v1761_v48  ;;  %v1786_v7 = vmul.f32 %v1776_v4, %v1765_v50  ;;  %v1832_v0 = vld [vmem:[%s3090_s9 + $0x8] sm:$0xff]  ;;  %v1833_v4 = vld [vmem:[%s3090_s9 + $0x10] sm:$0xff] }
 0x35b   : > { %v1314_v3 = vadd.f32 %v1313_v49, %v1312_v1 }
 0x35c   : > { %v1821_v2 = vpack.c.bf16 %v1785_v54, %v1783_v39  ;;  %v1822_v9 = vpack.c.bf16 %v1786_v7, %v1784_v52 }
 0x35d   : > { %v1315_v10 = vrot.slane %v1314_v3, 1 }
 0x35e   : > { %1947 = vmatprep.subr.bf16.mxu0 %v1822_v9 }
 0x35f   : > { %1948 = vmatpush1.bf16.msra.mxu0 %v1821_v2  ;;  %v1316_v6 = vadd.f32 %v1315_v10, %v1314_v3 }
 0x361   : > { %2265 = vpush %v1316_v6 }
 0x362   : > { %2196 = vmatmul.mubr.msk.bf16.vlgmr.msra.gmra.mrb[28].mxu0 %vm1885_vm10, %v2302_v20 }
 0x363   : > { %1987 = vmatprep.mubr.bf16.mxu0 %v2365_v27 }
 0x36a   : > { %2197 = vmatmul.mubr.msk.bf16.gmra.mrb[32].mxu0 %vm1885_vm10, %v2306_v58 }
 0x392   : > { %s2266_s23 = spop %2265 }
 0x393   : > { %p1318_p1 = scmp.ge.f32.partialorder %s2266_s23, 0.0  ;;  %s1319_s24 = smul.f32 %s2266_s23, %s3036_s19 }
 0x395   : > { %s3098_s23 = smov (!%p1318_p1, %s2266_s23), %s1319_s24 }
 0x396   : > { %v1321_v41 = vstv %s3098_s23 }
 0x397   : > { %v1323_v56 = vmul.f32 %v1321_v41, %v1251_v55  ;;  %v1322_v59 = vmul.f32 %v1321_v41, %v1250_v57  ;;  %v1325_v12 = vmul.f32 %v1321_v41, %v1253_v61  ;;  %v1324_v62 = vmul.f32 %v1321_v41, %v1252_v51 }
 0x399   : > { %1332 = vrot.lane.b32.xlu0 %v1323_v56, %s2356_s30  ;;  %1330 = vrot.lane.b32.xlu1 %v1322_v59, %s2356_s30 }
 0x39d   : > { %1336 = vrot.lane.b32.xlu0 %v1325_v12, %s2356_s30  ;;  %1334 = vrot.lane.b32.xlu1 %v1324_v62, %s2356_s30  ;;  %s1275_s30 = smul.f32 %s3038_s20, %s3036_s19 }
 0x39f   : > { %s3100_s20 = smov (!%p1274_p2, %s3038_s20), %s1275_s30 }
 0x3a0   : > { %v1277_v15 = vstv %s3100_s20 }
 0x3a1   : > { %1837 = vperm.xlu1 %2297, %v1831_v63   ;;  %1842 = vperm.xlu0 %2298, %v1832_v0   ;;  %v1278_v14 = vmul.f32 %v1277_v15, %v1250_v57  ;;  %v1279_v19 = vmul.f32 %v1277_v15, %v1251_v55  ;;  %v1280_v38 = vmul.f32 %v1277_v15, %v1252_v51 }
 0x3a2   : > { %v1281_v36 = vmul.f32 %v1277_v15, %v1253_v61 }
 0x3a5   : > { %1847 = vperm.xlu1 %2297, %v1833_v4  }
 0x3a9   : > { %1852 = vperm.xlu1 %2297, %v1834_v5  }
 0x3fb   : > { %v1926_v11 = vpop.f32.mrb[8].mxu1 }
 0x3fc   : > { %v1928_v16 = vpop.f32.mrb[9].mxu1 }
 0x3fd   : > { %v1930_v17 = vpop.f32.mrb[10].mxu1 }
 0x3fe   : > { %v1932_v60 = vpop.f32.mrb[11].mxu1 }
 0x403   : > { %v1936_v28 = vpop.f32.mrb[12].mxu1 }
 0x404   : > { %v1938_v18 = vpop.f32.mrb[13].mxu1 }
 0x405   : > { %v1940_v13 = vpop.f32.mrb[14].mxu1 }
 0x406   : > { %v1942_v44 = vpop.f32.mrb[15].mxu1 }
 0x40b   : > { %v1331_v21 = vpop.permute.xlu1 %1330  ;;  %v1333_v23 = vpop.permute.xlu0 %1332 }
 0x40c   : > { %v1342_v24 = vadd.f32 %v1331_v21, %v1278_v14  ;;  %v1343_v29 = vadd.f32 %v1333_v23, %v1279_v19 }
 0x40e   : > { %v2178_v26 = vmul.f32 -1.442695, %v1342_v24  ;;  %v2179_v8 = vmul.f32 -1.442695, %v1343_v29 }
 0x40f   : > { %v1335_v27 = vpop.permute.xlu1 %1334  ;;  %v1337_v31 = vpop.permute.xlu0 %1336 }
 0x410   : > { %2311 = vpow2.f32 %v2178_v26  ;;  %v1344_v32 = vadd.f32 %v1335_v27, %v1280_v38  ;;  %v1345_v40 = vadd.f32 %v1337_v31, %v1281_v36 }
 0x411   : > { %2313 = vpow2.f32 %v2179_v8 }
 0x412   : > { %v2180_v33 = vmul.f32 -1.442695, %v1344_v32  ;;  %v2181_v25 = vmul.f32 -1.442695, %v1345_v40 }
 0x414   : > { %2315 = vpow2.f32 %v2180_v33 }
 0x415   : > { %2317 = vpow2.f32 %v2181_v25 }
 0x41a   : > { %v2312_v37 = vpop.eup %2311 }
 0x41b   : > { %v2314_v22 = vpop.eup %2313  ;;  %v1358_v34 = vadd.f32 1.0, %v2312_v37 }
 0x41c   : > { %v1359_v47 = vadd.f32 1.0, %v2314_v22 }
 0x41d   : > { %2319 = vrcp.f32 %v1358_v34 }
 0x41e   : > { %v2316_v42 = vpop.eup %2315  ;;  %2321 = vrcp.f32 %v1359_v47 }
 0x41f   : > { %v2318_v35 = vpop.eup %2317  ;;  %v1360_v43 = vadd.f32 1.0, %v2316_v42 }
 0x420   : > { %v1361_v30 = vadd.f32 1.0, %v2318_v35  ;;  %v1838_v49 = vpop.permute.xlu1 %1837  ;;  %v1843_v48 = vpop.permute.xlu0 %1842 }
 0x421   : > { %2323 = vrcp.f32 %v1360_v43  ;;  %v1927_v50 = vadd.f32 %v1926_v11, %v1838_v49  ;;  %v1929_v39 = vadd.f32 %v1928_v16, %v1838_v49  ;;  %v1931_v54 = vadd.f32 %v1930_v17, %v1843_v48 }
 0x422   : > { %2325 = vrcp.f32 %v1361_v30  ;;  %v1933_v3 = vadd.f32 %v1932_v60, %v1843_v48 }
 0x424   : > { %v1848_v52 = vpop.permute.xlu1 %1847 }
 0x425   : > { %v1937_v57 = vadd.f32 %v1936_v28, %v1848_v52  ;;  %v1939_v56 = vadd.f32 %v1938_v18, %v1848_v52 }
 0x427   : > { %v2320_v45 = vpop.eup %2319 }
 0x428   : > { %v2322_v53 = vpop.eup %2321  ;;  %2000 = vperm.xlu0 %2298, %v2320_v45   ;;  %v1853_v41 = vpop.permute.xlu1 %1852 }
 0x429   : > { %2005 = vperm.xlu1 %2297, %v2322_v53   ;;  %v1941_v59 = vadd.f32 %v1940_v13, %v1853_v41  ;;  %v1943_v51 = vadd.f32 %v1942_v44, %v1853_v41 }
 0x42b   : > { %v2324_v1 = vpop.eup %2323 }
 0x42c   : > { %v2326_v46 = vpop.eup %2325  ;;  %2010 = vperm.xlu0 %2298, %v2324_v1  }
 0x42d   : > { %2015 = vperm.xlu1 %2297, %v2326_v46  }
 0x435   : > { %v1979_v7 = vpop.f32.mrb[28].mxu0 }
 0x436   : > { %v1980_v2 = vadd.f32 %v1979_v7, %v1927_v50  ;;  %v1981_v9 = vpop.f32.mrb[29].mxu0 }
 0x437   : > { %v1982_v10 = vadd.f32 %v1981_v9, %v1929_v39  ;;  %v1983_v20 = vpop.f32.mrb[30].mxu0 }
 0x438   : > { %v1985_v6 = vpop.f32.mrb[31].mxu0  ;;  %v1984_v58 = vadd.f32 %v1983_v20, %v1931_v54 }
 0x439   : > { %v1986_v55 = vadd.f32 %v1985_v6, %v1933_v3 }
 0x43d   : > { %v1989_v61 = vpop.f32.mrb[32].mxu0 }
 0x43e   : > { %v1990_v12 = vadd.f32 %v1989_v61, %v1937_v57  ;;  %v1991_v62 = vpop.f32.mrb[33].mxu0 }
 0x43f   : > { %v1992_v63 = vadd.f32 %v1991_v62, %v1939_v56  ;;  %v1993_v0 = vpop.f32.mrb[34].mxu0 }
 0x440   : > { %v1994_v4 = vadd.f32 %v1993_v0, %v1941_v59  ;;  %v1995_v5 = vpop.f32.mrb[35].mxu0 }
 0x441   : > { %v1996_v11 = vadd.f32 %v1995_v5, %v1943_v51 }
 0x4a7   : > { %v2001_v16 = vpop.permute.xlu0 %2000 }
 0x4a8   : > { %v2006_v17 = vpop.permute.xlu1 %2005  ;;  %v2018_v60 = vmul.f32 %v2001_v16, %v1980_v2  ;;  %v2019_v28 = vmul.f32 %v2001_v16, %v1982_v10 }
 0x4a9   : > { %v2020_v18 = vmul.f32 %v2006_v17, %v1984_v58  ;;  %v2021_v13 = vmul.f32 %v2006_v17, %v1986_v55 }
 0x4aa   : > { %2026 = vst [vmem:[%s487_s13] sm:$0xff] %v2018_v60  ;;  %2027 = vst [vmem:[%s487_s13 + $0x8] sm:$0xff] %v2019_v28 }
 0x4ab   : > { %2028 = vst [vmem:[%s487_s13 + $0x10] sm:$0xff] %v2020_v18  ;;  %2029 = vst [vmem:[%s487_s13 + $0x18] sm:$0xff] %v2021_v13  ;;  %v2011_v44 = vpop.permute.xlu0 %2010 }
 0x4ac   : > { %v2016_v15 = vpop.permute.xlu1 %2015  ;;  %v2022_v14 = vmul.f32 %v2011_v44, %v1990_v12  ;;  %v2023_v19 = vmul.f32 %v2011_v44, %v1992_v63 }
 0x4ad   : > { %v2024_v21 = vmul.f32 %v2016_v15, %v1994_v4  ;;  %v2025_v23 = vmul.f32 %v2016_v15, %v1996_v11 }
 0x4ae   : > { %2030 = vst [vmem:[%s487_s13 + $0x20] sm:$0xff] %v2022_v14  ;;  %2031 = vst [vmem:[%s487_s13 + $0x28] sm:$0xff] %v2023_v19 }
 0x4af   : > { %2032 = vst [vmem:[%s487_s13 + $0x30] sm:$0xff] %v2024_v21  ;;  %2033 = vst [vmem:[%s487_s13 + $0x38] sm:$0xff] %v2025_v23 }
 0x4b0 PF: > { %s23_s21 = sadd.s32 1, %s2352_s21  }
 0x4b1   : > { %p20_p3 = scmp.ge.s32.totalorder %s23_s21, 4  }
 0x4b3   :  { %22 = sbr.rel (!%p20_p3) target bundleno = 1 (0x1), region = 120 }
 0x4ba   :  { %2055 = vsyncpa [#allocation3], 1 }
 0x4bb   :  { %2057 = vsyncpa [#allocation3 + $0x1], 1 }

</bundles_post_ra>
